<compile_context>
chip_gen: v5e
topology: v5e:2x2
jax: 0.10.0
libtpu: 0.0.40
codegen_flags: <defaults>
</compile_context>

<pallas_src>
import functools

import jax
import jax.numpy as jnp
from jax.experimental import pallas as pl
from jax.experimental.pallas import tpu as pltpu


def _layer_norm(x, gamma, beta, eps=1e-5):
    mu = jnp.mean(x, axis=-1, keepdims=True)
    var = jnp.mean((x - mu) ** 2, axis=-1, keepdims=True)
    return (x - mu) * jax.lax.rsqrt(var + eps) * gamma + beta


def _dit_encoder_kernel(num_heads,
                        q_ref, mod_ref, ln1g_ref, ln1b_ref,
                        wqkv_ref, bqkv_ref, wo_ref, bo_ref,
                        lnfg_ref, lnfb_ref, wf_ref, bf_ref,
                        y_ref, h_ref, oslab_ref):
    """Grid = (batch_chunk, layer); the layer axis is innermost / sequential.

    h_ref   : VMEM scratch holding the residual stream for the current batch
              chunk across the layer axis (never written back to HBM).
    oslab_ref: VMEM scratch (N, E) bf16 staging slab for the concatenated
              per-head attention outputs (feeds a single full-depth output
              projection matmul).
    """
    l = pl.program_id(1)
    num_layers = pl.num_programs(1)
    Bb, S, E = h_ref.shape
    H = num_heads
    Dh = E // H
    N = Bb * S

    # Initialise the resident residual stream from the input on layer 0.
    @pl.when(l == 0)
    def _():
        h_ref[...] = q_ref[...]

    x = h_ref[...]                                    # (Bb, S, E) f32

    # adaLN modulation (precomputed in the wrapper); one fused block per step.
    mod = mod_ref[0]                                  # (Bb, 3, E) f32
    shift = mod[:, 0:1, :]                            # (Bb, 1, E)
    scale = mod[:, 1:2, :]
    gate = mod[:, 2:3, :]

    # norm1 + modulate, single bf16 cast for all QKV matmuls.
    xn = _layer_norm(x, ln1g_ref[0], ln1b_ref[0])     # (Bb, S, E)
    xm = xn * (1.0 + scale) + shift
    xm2d = xm.reshape(N, E).astype(jnp.bfloat16)

    inv_sqrt_d = 1.0 / float(Dh) ** 0.5
    # Static per-head loop. Each iteration does ONE fused QKV matmul with
    # output width 3*Dh and writes its attention output into the staging
    # slab in VMEM (no traced accumulator carried across iterations).
    for h in range(H):
        qkv_h = (jnp.dot(xm2d, wqkv_ref[0, h],
                         preferred_element_type=jnp.float32)
                 + bqkv_ref[0, h])                    # (N, 3*Dh) f32
        q_h = qkv_h[:, 0 * Dh:1 * Dh].reshape(Bb, S, Dh).astype(jnp.bfloat16)
        k_h = qkv_h[:, 1 * Dh:2 * Dh].reshape(Bb, S, Dh).astype(jnp.bfloat16)
        v_h = qkv_h[:, 2 * Dh:3 * Dh].reshape(Bb, S, Dh).astype(jnp.bfloat16)

        s = jnp.einsum("bqd,bkd->bqk", q_h, k_h,
                       preferred_element_type=jnp.float32) * inv_sqrt_d
        s = s - jnp.max(s, axis=-1, keepdims=True)
        p = jnp.exp(s)
        p = p * pl.reciprocal(jnp.sum(p, axis=-1, keepdims=True), approx=True)

        o_h = jnp.einsum("bqk,bkd->bqd", p.astype(jnp.bfloat16), v_h,
                         preferred_element_type=jnp.float32)  # (Bb, S, Dh)
        oslab_ref[:, h * Dh:(h + 1) * Dh] = (
            o_h.reshape(N, Dh).astype(jnp.bfloat16))

    # Single output projection with full contraction depth E.
    attn = (jnp.dot(oslab_ref[...], wo_ref[0],
                    preferred_element_type=jnp.float32).reshape(Bb, S, E)
            + bo_ref[0])
    x_new = x + gate * attn                           # adaLN gate, f32 residual
    h_ref[...] = x_new

    # TODO(synk): Dense MLP branch (dense_config) not implemented — the module
    # is configured with dense_config=None so that branch is skipped.

    # final LayerNorm + final Linear (out_dim > 0) on the last layer only.
    @pl.when(l == num_layers - 1)
    def _():
        xf = _layer_norm(x_new, lnfg_ref[...], lnfb_ref[...])
        y = (jnp.dot(xf.reshape(N, E).astype(jnp.bfloat16), wf_ref[...],
                     preferred_element_type=jnp.float32) + bf_ref[...])
        y_ref[...] = y.reshape(Bb, S, y_ref.shape[-1]).astype(y_ref.dtype)


def _device_kind():
    try:
        return jax.devices()[0].device_kind.lower()
    except Exception:
        return ""


def _num_batch_chunks(B):
    # Only chips with 2 TensorCores (v7x) benefit from a 2-way "parallel"
    # chunk axis; on v5e/v6e it just doubles weight HBM traffic.
    kind = _device_kind()
    two_tc = "v7" in kind
    return 2 if (two_tc and B >= 2 and B % 2 == 0) else 1


def _vmem_limit_bytes():
    kind = _device_kind()
    if "v7" in kind:
        return 48 * 1024 * 1024       # v7x: 64 MiB / TC, leave headroom
    if ("v5" in kind) or ("v6" in kind) or ("v4" in kind):
        return 96 * 1024 * 1024       # 128 MiB VMEM parts
    return 32 * 1024 * 1024           # conservative fallback


def dit_encoder_forward(q, ctx, params, num_heads):
    B, S, E = q.shape
    H = num_heads
    assert E % H == 0
    Dh = E // H
    L = params["wqkv"].shape[0]
    OUT = params["wf"].shape[-1]
    OUT_PAD = ((OUT + 127) // 128) * 128      # lane-dense output stores

    # ---------- wrapper-side (XLA) preprocessing, done once ----------
    # adaLN hoist: only the MSA chunks (shift/scale/gate) are live because
    # dense_config=None, so only the first 3E columns are ever computed.
    c_silu = jax.nn.silu(ctx)                                       # (B, C)
    mod = (jnp.einsum("bc,lcd->lbd", c_silu, params["adaw"][:, :, :3 * E])
           + params["adab"][:, None, :3 * E])                       # (L, B, 3E)
    mod3 = mod.reshape(L, B, 3, E)              # [shift | scale | gate] fused

    # Fused per-head QKV weights: (L, H, E, 3*Dh) bf16 — one matmul per head.
    wq, wk, wv = jnp.split(params["wqkv"], 3, axis=-1)              # (L, E, E)

    def w_heads(w):
        return w.reshape(L, E, H, Dh).transpose(0, 2, 1, 3)         # (L,H,E,Dh)

    wqkv_h = jnp.concatenate([w_heads(wq), w_heads(wk), w_heads(wv)],
                             axis=-1).astype(jnp.bfloat16)          # (L,H,E,3Dh)
    bq, bk, bv = jnp.split(params["bqkv"], 3, axis=-1)              # (L, E)

    def b_heads(b):
        return b.reshape(L, H, 1, Dh)

    bqkv_h = jnp.concatenate([b_heads(bq), b_heads(bk), b_heads(bv)],
                             axis=-1)                               # (L,H,1,3Dh)

    wo = params["wo"].astype(jnp.bfloat16)                          # (L, E, E)
    bo = params["bo"].reshape(L, 1, E)
    ln1g = params["ln1g"].reshape(L, 1, E)
    ln1b = params["ln1b"].reshape(L, 1, E)
    lnfg = params["lnfg"].reshape(1, E)
    lnfb = params["lnfb"].reshape(1, E)
    wf = jnp.zeros((E, OUT_PAD), jnp.bfloat16).at[:, :OUT].set(
        params["wf"].astype(jnp.bfloat16))
    bf = jnp.zeros((1, OUT_PAD), jnp.float32).at[:, :OUT].set(
        params["bf"].reshape(1, OUT))

    NC = _num_batch_chunks(B)
    Bb = B // NC

    in_specs = [
        pl.BlockSpec((Bb, S, E), lambda c, l: (c, 0, 0)),            # q
        pl.BlockSpec((1, Bb, 3, E), lambda c, l: (l, c, 0, 0)),      # mod fused
        pl.BlockSpec((1, 1, E), lambda c, l: (l, 0, 0)),             # ln1 gamma
        pl.BlockSpec((1, 1, E), lambda c, l: (l, 0, 0)),             # ln1 beta
        pl.BlockSpec((1, H, E, 3 * Dh), lambda c, l: (l, 0, 0, 0)),  # wqkv fused
        pl.BlockSpec((1, H, 1, 3 * Dh), lambda c, l: (l, 0, 0, 0)),  # bqkv fused
        pl.BlockSpec((1, E, E), lambda c, l: (l, 0, 0)),             # wo
        pl.BlockSpec((1, 1, E), lambda c, l: (l, 0, 0)),             # bo
        pl.BlockSpec((1, E), lambda c, l: (0, 0)),                   # final LN g
        pl.BlockSpec((1, E), lambda c, l: (0, 0)),                   # final LN b
        pl.BlockSpec((E, OUT_PAD), lambda c, l: (0, 0)),             # wf (padded)
        pl.BlockSpec((1, OUT_PAD), lambda c, l: (0, 0)),             # bf (padded)
    ]

    kernel = functools.partial(_dit_encoder_kernel, H)
    y_pad = pl.pallas_call(
        kernel,
        out_shape=jax.ShapeDtypeStruct((B, S, OUT_PAD), jnp.bfloat16),
        grid_spec=pltpu.PrefetchScalarGridSpec(
            num_scalar_prefetch=0,
            grid=(NC, L),                      # layer axis innermost/sequential
            in_specs=in_specs,
            out_specs=pl.BlockSpec((Bb, S, OUT_PAD), lambda c, l: (c, 0, 0)),
            scratch_shapes=[
                pltpu.VMEM((Bb, S, E), jnp.float32),     # residual stream
                pltpu.VMEM((Bb * S, E), jnp.bfloat16),   # head-output slab
            ],
        ),
        compiler_params=pltpu.CompilerParams(
            dimension_semantics=("parallel", "arbitrary"),
            vmem_limit_bytes=_vmem_limit_bytes(),
        ),
    )(q, mod3, ln1g, ln1b, wqkv_h, bqkv_h, wo, bo, lnfg, lnfb, wf, bf)
    return y_pad[..., :OUT]


def dit_encoder_ref(q, ctx, params, num_heads):
    """Pure-JAX reference mirroring the PyTorch forward with the same
    mixed-precision policy as the kernel (bf16 matmul inputs, f32 accumulation,
    f32 LayerNorm / softmax / residual)."""
    B, S, E = q.shape
    L = params["wqkv"].shape[0]
    H = num_heads
    Dh = E // H
    inv_sqrt_d = 1.0 / float(Dh) ** 0.5

    def layer_norm(x, g, b):
        mu = jnp.mean(x, axis=-1, keepdims=True)
        var = jnp.mean((x - mu) ** 2, axis=-1, keepdims=True)
        return (x - mu) * jax.lax.rsqrt(var + 1e-5) * g + b

    x = q
    for l in range(L):
        mod = jax.nn.silu(ctx) @ params["adaw"][l] + params["adab"][l]
        sh_msa = mod[:, 0 * E:1 * E]
        sc_msa = mod[:, 1 * E:2 * E]
        g_msa = mod[:, 2 * E:3 * E]
        xn = layer_norm(x, params["ln1g"][l], params["ln1b"][l])
        xm = xn * (1 + sc_msa[:, None, :]) + sh_msa[:, None, :]
        qkv = jnp.einsum("bse,ef->bsf", xm.astype(jnp.bfloat16),
                         params["wqkv"][l].astype(jnp.bfloat16),
                         preferred_element_type=jnp.float32) + params["bqkv"][l]
        q_p, k_p, v_p = jnp.split(qkv, 3, axis=-1)

        def heads(t):
            return t.reshape(B, S, H, Dh).transpose(0, 2, 1, 3)

        qh, kh, vh = heads(q_p), heads(k_p), heads(v_p)
        s = jnp.einsum("bhqd,bhkd->bhqk", qh.astype(jnp.bfloat16),
                       kh.astype(jnp.bfloat16),
                       preferred_element_type=jnp.float32) * inv_sqrt_d
        a = jax.nn.softmax(s, axis=-1)
        o = jnp.einsum("bhqk,bhkd->bhqd", a.astype(jnp.bfloat16),
                       vh.astype(jnp.bfloat16),
                       preferred_element_type=jnp.float32)
        o = o.transpose(0, 2, 1, 3).reshape(B, S, E)
        attn = jnp.einsum("bse,ef->bsf", o.astype(jnp.bfloat16),
                          params["wo"][l].astype(jnp.bfloat16),
                          preferred_element_type=jnp.float32) + params["bo"][l]
        x = x + g_msa[:, None, :] * attn
    xf = layer_norm(x, params["lnfg"], params["lnfb"])
    return jnp.einsum("bse,eo->bso", xf.astype(jnp.bfloat16),
                      params["wf"].astype(jnp.bfloat16),
                      preferred_element_type=jnp.float32) + params["bf"]


if __name__ == "__main__":
    B, S, E, H, C, L, OUT = 2, 8, 32, 4, 16, 2, 16

    key = jax.random.PRNGKey(0)
    ks = jax.random.split(key, 10)
    scale = 0.1
    params = dict(
        ln1g=jnp.ones((L, E), jnp.float32),          # nn.LayerNorm defaults
        ln1b=jnp.zeros((L, E), jnp.float32),
        adaw=scale * jax.random.normal(ks[0], (L, C, 6 * E), jnp.float32),
        adab=scale * jax.random.normal(ks[1], (L, 6 * E), jnp.float32),
        wqkv=scale * jax.random.normal(ks[2], (L, E, 3 * E), jnp.float32),
        bqkv=scale * jax.random.normal(ks[3], (L, 3 * E), jnp.float32),
        wo=scale * jax.random.normal(ks[4], (L, E, E), jnp.float32),
        bo=scale * jax.random.normal(ks[5], (L, E), jnp.float32),
        lnfg=jnp.ones((E,), jnp.float32),
        lnfb=jnp.zeros((E,), jnp.float32),
        wf=scale * jax.random.normal(ks[6], (E, OUT), jnp.float32),
        bf=scale * jax.random.normal(ks[7], (OUT,), jnp.float32),
    )
    q = jax.random.normal(ks[8], (B, S, E), jnp.float32)
    ctx = jax.random.normal(ks[9], (B, C), jnp.float32)

    y = dit_encoder_forward(q, ctx, params, H)
    y = jax.block_until_ready(y)

    y_ref = dit_encoder_ref(q, ctx, params, H)
    y_f32 = y.astype(jnp.float32)
    max_err = float(jnp.max(jnp.abs(y_f32 - y_ref)))
    # bf16 output + approx softmax reciprocal => slightly looser tolerance.
    assert jnp.allclose(y_f32, y_ref, atol=2e-2, rtol=2e-2), \
        f"max abs err {max_err}"

    print("KERNEL_OK")
</pallas_src>

<mosaic_0001>
module attributes {stable_mosaic.version = 11 : i64} {
  func.func @_dit_encoder_kernel(%arg0: i32, %arg1: i32, %arg2: memref<2x8x32xf32, #tpu.memory_space<vmem>>, %arg3: memref<1x2x3x32xf32, #tpu.memory_space<vmem>>, %arg4: memref<1x1x32xf32, #tpu.memory_space<vmem>>, %arg5: memref<1x1x32xf32, #tpu.memory_space<vmem>>, %arg6: memref<1x4x32x24xbf16, #tpu.memory_space<vmem>>, %arg7: memref<1x4x1x24xf32, #tpu.memory_space<vmem>>, %arg8: memref<1x32x32xbf16, #tpu.memory_space<vmem>>, %arg9: memref<1x1x32xf32, #tpu.memory_space<vmem>>, %arg10: memref<1x32xf32, #tpu.memory_space<vmem>>, %arg11: memref<1x32xf32, #tpu.memory_space<vmem>>, %arg12: memref<32x128xbf16, #tpu.memory_space<vmem>>, %arg13: memref<1x128xf32, #tpu.memory_space<vmem>>, %arg14: memref<2x8x128xbf16, #tpu.memory_space<vmem>>, %arg15: memref<2x8x32xf32, #tpu.memory_space<vmem>>, %arg16: memref<16x32xbf16, #tpu.memory_space<vmem>>) attributes {dimension_semantics = [#tpu.dimension_semantics<parallel>, #tpu.dimension_semantics<arbitrary>], iteration_bounds = array<i64: 1, 2>, scalar_prefetch = 0 : i64, scratch_operands = 2 : i64, tpu.core_type = #tpu.core_type<tc>, window_params = [{transform_indices = @transform_0, window_bounds = array<i64: 2, 8, 32>}, {transform_indices = @transform_1, window_bounds = array<i64: 1, 2, 3, 32>}, {transform_indices = @transform_2, window_bounds = array<i64: 1, 1, 32>}, {transform_indices = @transform_3, window_bounds = array<i64: 1, 1, 32>}, {transform_indices = @transform_4, window_bounds = array<i64: 1, 4, 32, 24>}, {transform_indices = @transform_5, window_bounds = array<i64: 1, 4, 1, 24>}, {transform_indices = @transform_6, window_bounds = array<i64: 1, 32, 32>}, {transform_indices = @transform_7, window_bounds = array<i64: 1, 1, 32>}, {pipeline_mode = #tpu.pipeline_mode<synchronous>, transform_indices = @transform_8, window_bounds = array<i64: 1, 32>}, {pipeline_mode = #tpu.pipeline_mode<synchronous>, transform_indices = @transform_9, window_bounds = array<i64: 1, 32>}, {pipeline_mode = #tpu.pipeline_mode<synchronous>, transform_indices = @transform_10, window_bounds = array<i64: 32, 128>}, {pipeline_mode = #tpu.pipeline_mode<synchronous>, transform_indices = @transform_11, window_bounds = array<i64: 1, 128>}, {transform_indices = @transform_12, window_bounds = array<i64: 2, 8, 128>}]} {
    %c0_i32 = arith.constant 0 : i32
    %0 = arith.cmpi eq, %arg1, %c0_i32 : i32
    %1 = arith.extui %0 : i1 to i32
    %c0_i32_0 = arith.constant 0 : i32
    %2 = arith.cmpi ne, %1, %c0_i32_0 : i32
    scf.if %2 {
      %c0_89 = arith.constant 0 : index
      %c0_90 = arith.constant 0 : index
      %c0_91 = arith.constant 0 : index
      %198 = vector.load %arg2[%c0_89, %c0_90, %c0_91] : memref<2x8x32xf32, #tpu.memory_space<vmem>>, vector<2x8x32xf32>
      %c0_92 = arith.constant 0 : index
      %c0_93 = arith.constant 0 : index
      %c0_94 = arith.constant 0 : index
      %199 = vector.load %arg15[%c0_92, %c0_93, %c0_94] : memref<2x8x32xf32, #tpu.memory_space<vmem>>, vector<2x8x32xf32>
      tpu.vector_store %arg15[%c0_92, %c0_93, %c0_94], %198 {strides = array<i32>} : memref<2x8x32xf32, #tpu.memory_space<vmem>>, vector<2x8x32xf32>,
    } else {
    }
    %c0 = arith.constant 0 : index
    %c0_1 = arith.constant 0 : index
    %c0_2 = arith.constant 0 : index
    %3 = vector.load %arg15[%c0, %c0_1, %c0_2] : memref<2x8x32xf32, #tpu.memory_space<vmem>>, vector<2x8x32xf32>
    %c0_3 = arith.constant 0 : index
    %c0_4 = arith.constant 0 : index
    %c0_5 = arith.constant 0 : index
    %c0_6 = arith.constant 0 : index
    %4 = vector.load %arg3[%c0_3, %c0_4, %c0_5, %c0_6] : memref<1x2x3x32xf32, #tpu.memory_space<vmem>>, vector<1x2x3x32xf32>
    %5 = vector.shape_cast %4 : vector<1x2x3x32xf32> to vector<2x3x32xf32>
    %6 = vector.extract_strided_slice %5 {offsets = [0, 0, 0], sizes = [2, 1, 32], strides = [1, 1, 1]} : vector<2x3x32xf32> to vector<2x1x32xf32>
    %7 = vector.extract_strided_slice %5 {offsets = [0, 1, 0], sizes = [2, 1, 32], strides = [1, 1, 1]} : vector<2x3x32xf32> to vector<2x1x32xf32>
    %8 = vector.extract_strided_slice %5 {offsets = [0, 2, 0], sizes = [2, 1, 32], strides = [1, 1, 1]} : vector<2x3x32xf32> to vector<2x1x32xf32>
    %c0_7 = arith.constant 0 : index
    %c0_8 = arith.constant 0 : index
    %c0_9 = arith.constant 0 : index
    %9 = vector.load %arg4[%c0_7, %c0_8, %c0_9] : memref<1x1x32xf32, #tpu.memory_space<vmem>>, vector<1x1x32xf32>
    %10 = vector.shape_cast %9 : vector<1x1x32xf32> to vector<1x32xf32>
    %c0_10 = arith.constant 0 : index
    %c0_11 = arith.constant 0 : index
    %c0_12 = arith.constant 0 : index
    %11 = vector.load %arg5[%c0_10, %c0_11, %c0_12] : memref<1x1x32xf32, #tpu.memory_space<vmem>>, vector<1x1x32xf32>
    %12 = vector.shape_cast %11 : vector<1x1x32xf32> to vector<1x32xf32>
    %cst = arith.constant dense<0.000000e+00> : vector<2x8xf32>
    %13 = vector.multi_reduction <add>, %3, %cst [2] : vector<2x8x32xf32> to vector<2x8xf32>
    %14 = vector.shape_cast %13 : vector<2x8xf32> to vector<2x8x1xf32>
    %cst_13 = arith.constant 3.200000e+01 : f32
    %15 = vector.broadcast %cst_13 : f32 to vector<2x8x1xf32>
    %16 = arith.divf %14, %15 : vector<2x8x1xf32>
    %17 = vector.broadcast %16 : vector<2x8x1xf32> to vector<2x8x32xf32>
    %18 = arith.subf %3, %17 : vector<2x8x32xf32>
    %19 = arith.mulf %18, %18 : vector<2x8x32xf32>
    %cst_14 = arith.constant dense<0.000000e+00> : vector<2x8xf32>
    %20 = vector.multi_reduction <add>, %19, %cst_14 [2] : vector<2x8x32xf32> to vector<2x8xf32>
    %21 = vector.shape_cast %20 : vector<2x8xf32> to vector<2x8x1xf32>
    %cst_15 = arith.constant 3.200000e+01 : f32
    %22 = vector.broadcast %cst_15 : f32 to vector<2x8x1xf32>
    %23 = arith.divf %21, %22 : vector<2x8x1xf32>
    %24 = vector.broadcast %16 : vector<2x8x1xf32> to vector<2x8x32xf32>
    %25 = arith.subf %3, %24 : vector<2x8x32xf32>
    %cst_16 = arith.constant 9.99999974E-6 : f32
    %26 = vector.broadcast %cst_16 : f32 to vector<2x8x1xf32>
    %27 = arith.addf %23, %26 : vector<2x8x1xf32>
    %28 = math.rsqrt %27 : vector<2x8x1xf32>
    %29 = vector.broadcast %28 : vector<2x8x1xf32> to vector<2x8x32xf32>
    %30 = arith.mulf %25, %29 : vector<2x8x32xf32>
    %31 = vector.shape_cast %10 : vector<1x32xf32> to vector<1x1x32xf32>
    %32 = vector.broadcast %31 : vector<1x1x32xf32> to vector<2x8x32xf32>
    %33 = arith.mulf %30, %32 : vector<2x8x32xf32>
    %34 = vector.shape_cast %12 : vector<1x32xf32> to vector<1x1x32xf32>
    %35 = vector.broadcast %34 : vector<1x1x32xf32> to vector<2x8x32xf32>
    %36 = arith.addf %33, %35 : vector<2x8x32xf32>
    %cst_17 = arith.constant 1.000000e+00 : f32
    %37 = vector.broadcast %cst_17 : f32 to vector<2x1x32xf32>
    %38 = arith.addf %37, %7 : vector<2x1x32xf32>
    %39 = vector.broadcast %38 : vector<2x1x32xf32> to vector<2x8x32xf32>
    %40 = arith.mulf %36, %39 : vector<2x8x32xf32>
    %41 = vector.broadcast %6 : vector<2x1x32xf32> to vector<2x8x32xf32>
    %42 = arith.addf %40, %41 : vector<2x8x32xf32>
    %43 = vector.shape_cast %42 : vector<2x8x32xf32> to vector<16x32xf32>
    %44 = arith.truncf %43 : vector<16x32xf32> to vector<16x32xbf16>
    %c0_18 = arith.constant 0 : index
    %c0_19 = arith.constant 0 : index
    %c0_20 = arith.constant 0 : index
    %c0_21 = arith.constant 0 : index
    %45 = vector.load %arg6[%c0_18, %c0_19, %c0_20, %c0_21] : memref<1x4x32x24xbf16, #tpu.memory_space<vmem>>, vector<1x1x32x24xbf16>
    %46 = vector.shape_cast %45 : vector<1x1x32x24xbf16> to vector<32x24xbf16>
    %cst_22 = arith.constant dense<0.000000e+00> : vector<16x24xf32>
    %47 = tpu.matmul %44, %46, %cst_22 {dimension_numbers = #tpu.dot_dimension_numbers<[1], [0], [0], [1], [0, 0, 1, 1], [], []>} : vector<16x32xbf16>, vector<32x24xbf16>, vector<16x24xf32> -> vector<16x24xf32>
    %c0_23 = arith.constant 0 : index
    %c0_24 = arith.constant 0 : index
    %c0_25 = arith.constant 0 : index
    %c0_26 = arith.constant 0 : index
    %48 = vector.load %arg7[%c0_23, %c0_24, %c0_25, %c0_26] : memref<1x4x1x24xf32, #tpu.memory_space<vmem>>, vector<1x1x1x24xf32>
    %49 = vector.shape_cast %48 : vector<1x1x1x24xf32> to vector<1x24xf32>
    %50 = vector.broadcast %49 : vector<1x24xf32> to vector<16x24xf32>
    %51 = arith.addf %47, %50 : vector<16x24xf32>
    %52 = vector.extract_strided_slice %51 {offsets = [0, 0], sizes = [16, 8], strides = [1, 1]} : vector<16x24xf32> to vector<16x8xf32>
    %53 = vector.shape_cast %52 : vector<16x8xf32> to vector<2x8x8xf32>
    %54 = arith.truncf %53 : vector<2x8x8xf32> to vector<2x8x8xbf16>
    %55 = vector.extract_strided_slice %51 {offsets = [0, 8], sizes = [16, 8], strides = [1, 1]} : vector<16x24xf32> to vector<16x8xf32>
    %56 = vector.shape_cast %55 : vector<16x8xf32> to vector<2x8x8xf32>
    %57 = arith.truncf %56 : vector<2x8x8xf32> to vector<2x8x8xbf16>
    %58 = vector.extract_strided_slice %51 {offsets = [0, 16], sizes = [16, 8], strides = [1, 1]} : vector<16x24xf32> to vector<16x8xf32>
    %59 = vector.shape_cast %58 : vector<16x8xf32> to vector<2x8x8xf32>
    %60 = arith.truncf %59 : vector<2x8x8xf32> to vector<2x8x8xbf16>
    "tpu.trace_start"() <{level = 10 : i32, message = "bqd,bkd->bqk"}> : () -> ()
    %cst_27 = arith.constant dense<0.000000e+00> : vector<2x8x8xf32>
    %61 = tpu.matmul %54, %57, %cst_27 {dimension_numbers = #tpu.dot_dimension_numbers<[2], [2], [1], [1], [0, 0, 0, 1, 1, 1], [0], [0]>} : vector<2x8x8xbf16>, vector<2x8x8xbf16>, vector<2x8x8xf32> -> vector<2x8x8xf32>
    "tpu.trace_stop"() : () -> ()
    %cst_28 = arith.constant 0.353553385 : f32
    %62 = vector.broadcast %cst_28 : f32 to vector<2x8x8xf32>
    %63 = arith.mulf %61, %62 : vector<2x8x8xf32>
    %cst_29 = arith.constant dense<0xFF800000> : vector<2x8xf32>
    %64 = vector.multi_reduction <maximumf>, %63, %cst_29 [2] : vector<2x8x8xf32> to vector<2x8xf32>
    %65 = vector.shape_cast %64 : vector<2x8xf32> to vector<2x8x1xf32>
    %66 = vector.broadcast %65 : vector<2x8x1xf32> to vector<2x8x8xf32>
    %67 = arith.subf %63, %66 : vector<2x8x8xf32>
    %68 = math.exp %67 : vector<2x8x8xf32>
    %cst_30 = arith.constant dense<0.000000e+00> : vector<2x8xf32>
    %69 = vector.multi_reduction <add>, %68, %cst_30 [2] : vector<2x8x8xf32> to vector<2x8xf32>
    %70 = vector.shape_cast %69 : vector<2x8xf32> to vector<2x8x1xf32>
    %71 = tpu.reciprocal %70 {approx = true} : vector<2x8x1xf32> -> vector<2x8x1xf32>
    %72 = vector.broadcast %71 : vector<2x8x1xf32> to vector<2x8x8xf32>
    %73 = arith.mulf %68, %72 : vector<2x8x8xf32>
    %74 = arith.truncf %73 : vector<2x8x8xf32> to vector<2x8x8xbf16>
    "tpu.trace_start"() <{level = 10 : i32, message = "bqk,bkd->bqd"}> : () -> ()
    %cst_31 = arith.constant dense<0.000000e+00> : vector<2x8x8xf32>
    %75 = tpu.matmul %74, %60, %cst_31 {dimension_numbers = #tpu.dot_dimension_numbers<[2], [1], [1], [2], [0, 0, 0, 1, 1, 2], [0], [0]>} : vector<2x8x8xbf16>, vector<2x8x8xbf16>, vector<2x8x8xf32> -> vector<2x8x8xf32>
    "tpu.trace_stop"() : () -> ()
    %76 = vector.shape_cast %75 : vector<2x8x8xf32> to vector<16x8xf32>
    %77 = arith.truncf %76 : vector<16x8xf32> to vector<16x8xbf16>
    %c0_32 = arith.constant 0 : index
    %c0_33 = arith.constant 0 : index
    %78 = vector.load %arg16[%c0_32, %c0_33] : memref<16x32xbf16, #tpu.memory_space<vmem>>, vector<16x8xbf16>
    tpu.vector_store %arg16[%c0_32, %c0_33], %77 {strides = array<i32>} : memref<16x32xbf16, #tpu.memory_space<vmem>>, vector<16x8xbf16>,
    %c0_34 = arith.constant 0 : index
    %c1 = arith.constant 1 : index
    %c0_35 = arith.constant 0 : index
    %c0_36 = arith.constant 0 : index
    %79 = vector.load %arg6[%c0_34, %c1, %c0_35, %c0_36] : memref<1x4x32x24xbf16, #tpu.memory_space<vmem>>, vector<1x1x32x24xbf16>
    %80 = vector.shape_cast %79 : vector<1x1x32x24xbf16> to vector<32x24xbf16>
    %cst_37 = arith.constant dense<0.000000e+00> : vector<16x24xf32>
    %81 = tpu.matmul %44, %80, %cst_37 {dimension_numbers = #tpu.dot_dimension_numbers<[1], [0], [0], [1], [0, 0, 1, 1], [], []>} : vector<16x32xbf16>, vector<32x24xbf16>, vector<16x24xf32> -> vector<16x24xf32>
    %c0_38 = arith.constant 0 : index
    %c1_39 = arith.constant 1 : index
    %c0_40 = arith.constant 0 : index
    %c0_41 = arith.constant 0 : index
    %82 = vector.load %arg7[%c0_38, %c1_39, %c0_40, %c0_41] : memref<1x4x1x24xf32, #tpu.memory_space<vmem>>, vector<1x1x1x24xf32>
    %83 = vector.shape_cast %82 : vector<1x1x1x24xf32> to vector<1x24xf32>
    %84 = vector.broadcast %83 : vector<1x24xf32> to vector<16x24xf32>
    %85 = arith.addf %81, %84 : vector<16x24xf32>
    %86 = vector.extract_strided_slice %85 {offsets = [0, 0], sizes = [16, 8], strides = [1, 1]} : vector<16x24xf32> to vector<16x8xf32>
    %87 = vector.shape_cast %86 : vector<16x8xf32> to vector<2x8x8xf32>
    %88 = arith.truncf %87 : vector<2x8x8xf32> to vector<2x8x8xbf16>
    %89 = vector.extract_strided_slice %85 {offsets = [0, 8], sizes = [16, 8], strides = [1, 1]} : vector<16x24xf32> to vector<16x8xf32>
    %90 = vector.shape_cast %89 : vector<16x8xf32> to vector<2x8x8xf32>
    %91 = arith.truncf %90 : vector<2x8x8xf32> to vector<2x8x8xbf16>
    %92 = vector.extract_strided_slice %85 {offsets = [0, 16], sizes = [16, 8], strides = [1, 1]} : vector<16x24xf32> to vector<16x8xf32>
    %93 = vector.shape_cast %92 : vector<16x8xf32> to vector<2x8x8xf32>
    %94 = arith.truncf %93 : vector<2x8x8xf32> to vector<2x8x8xbf16>
    "tpu.trace_start"() <{level = 10 : i32, message = "bqd,bkd->bqk"}> : () -> ()
    %cst_42 = arith.constant dense<0.000000e+00> : vector<2x8x8xf32>
    %95 = tpu.matmul %88, %91, %cst_42 {dimension_numbers = #tpu.dot_dimension_numbers<[2], [2], [1], [1], [0, 0, 0, 1, 1, 1], [0], [0]>} : vector<2x8x8xbf16>, vector<2x8x8xbf16>, vector<2x8x8xf32> -> vector<2x8x8xf32>
    "tpu.trace_stop"() : () -> ()
    %cst_43 = arith.constant 0.353553385 : f32
    %96 = vector.broadcast %cst_43 : f32 to vector<2x8x8xf32>
    %97 = arith.mulf %95, %96 : vector<2x8x8xf32>
    %cst_44 = arith.constant dense<0xFF800000> : vector<2x8xf32>
    %98 = vector.multi_reduction <maximumf>, %97, %cst_44 [2] : vector<2x8x8xf32> to vector<2x8xf32>
    %99 = vector.shape_cast %98 : vector<2x8xf32> to vector<2x8x1xf32>
    %100 = vector.broadcast %99 : vector<2x8x1xf32> to vector<2x8x8xf32>
    %101 = arith.subf %97, %100 : vector<2x8x8xf32>
    %102 = math.exp %101 : vector<2x8x8xf32>
    %cst_45 = arith.constant dense<0.000000e+00> : vector<2x8xf32>
    %103 = vector.multi_reduction <add>, %102, %cst_45 [2] : vector<2x8x8xf32> to vector<2x8xf32>
    %104 = vector.shape_cast %103 : vector<2x8xf32> to vector<2x8x1xf32>
    %105 = tpu.reciprocal %104 {approx = true} : vector<2x8x1xf32> -> vector<2x8x1xf32>
    %106 = vector.broadcast %105 : vector<2x8x1xf32> to vector<2x8x8xf32>
    %107 = arith.mulf %102, %106 : vector<2x8x8xf32>
    %108 = arith.truncf %107 : vector<2x8x8xf32> to vector<2x8x8xbf16>
    "tpu.trace_start"() <{level = 10 : i32, message = "bqk,bkd->bqd"}> : () -> ()
    %cst_46 = arith.constant dense<0.000000e+00> : vector<2x8x8xf32>
    %109 = tpu.matmul %108, %94, %cst_46 {dimension_numbers = #tpu.dot_dimension_numbers<[2], [1], [1], [2], [0, 0, 0, 1, 1, 2], [0], [0]>} : vector<2x8x8xbf16>, vector<2x8x8xbf16>, vector<2x8x8xf32> -> vector<2x8x8xf32>
    "tpu.trace_stop"() : () -> ()
    %110 = vector.shape_cast %109 : vector<2x8x8xf32> to vector<16x8xf32>
    %111 = arith.truncf %110 : vector<16x8xf32> to vector<16x8xbf16>
    %c0_47 = arith.constant 0 : index
    %c8 = arith.constant 8 : index
    %112 = vector.load %arg16[%c0_47, %c8] : memref<16x32xbf16, #tpu.memory_space<vmem>>, vector<16x8xbf16>
    tpu.vector_store %arg16[%c0_47, %c8], %111 {strides = array<i32>} : memref<16x32xbf16, #tpu.memory_space<vmem>>, vector<16x8xbf16>,
    %c0_48 = arith.constant 0 : index
    %c2 = arith.constant 2 : index
    %c0_49 = arith.constant 0 : index
    %c0_50 = arith.constant 0 : index
    %113 = vector.load %arg6[%c0_48, %c2, %c0_49, %c0_50] : memref<1x4x32x24xbf16, #tpu.memory_space<vmem>>, vector<1x1x32x24xbf16>
    %114 = vector.shape_cast %113 : vector<1x1x32x24xbf16> to vector<32x24xbf16>
    %cst_51 = arith.constant dense<0.000000e+00> : vector<16x24xf32>
    %115 = tpu.matmul %44, %114, %cst_51 {dimension_numbers = #tpu.dot_dimension_numbers<[1], [0], [0], [1], [0, 0, 1, 1], [], []>} : vector<16x32xbf16>, vector<32x24xbf16>, vector<16x24xf32> -> vector<16x24xf32>
    %c0_52 = arith.constant 0 : index
    %c2_53 = arith.constant 2 : index
    %c0_54 = arith.constant 0 : index
    %c0_55 = arith.constant 0 : index
    %116 = vector.load %arg7[%c0_52, %c2_53, %c0_54, %c0_55] : memref<1x4x1x24xf32, #tpu.memory_space<vmem>>, vector<1x1x1x24xf32>
    %117 = vector.shape_cast %116 : vector<1x1x1x24xf32> to vector<1x24xf32>
    %118 = vector.broadcast %117 : vector<1x24xf32> to vector<16x24xf32>
    %119 = arith.addf %115, %118 : vector<16x24xf32>
    %120 = vector.extract_strided_slice %119 {offsets = [0, 0], sizes = [16, 8], strides = [1, 1]} : vector<16x24xf32> to vector<16x8xf32>
    %121 = vector.shape_cast %120 : vector<16x8xf32> to vector<2x8x8xf32>
    %122 = arith.truncf %121 : vector<2x8x8xf32> to vector<2x8x8xbf16>
    %123 = vector.extract_strided_slice %119 {offsets = [0, 8], sizes = [16, 8], strides = [1, 1]} : vector<16x24xf32> to vector<16x8xf32>
    %124 = vector.shape_cast %123 : vector<16x8xf32> to vector<2x8x8xf32>
    %125 = arith.truncf %124 : vector<2x8x8xf32> to vector<2x8x8xbf16>
    %126 = vector.extract_strided_slice %119 {offsets = [0, 16], sizes = [16, 8], strides = [1, 1]} : vector<16x24xf32> to vector<16x8xf32>
    %127 = vector.shape_cast %126 : vector<16x8xf32> to vector<2x8x8xf32>
    %128 = arith.truncf %127 : vector<2x8x8xf32> to vector<2x8x8xbf16>
    "tpu.trace_start"() <{level = 10 : i32, message = "bqd,bkd->bqk"}> : () -> ()
    %cst_56 = arith.constant dense<0.000000e+00> : vector<2x8x8xf32>
    %129 = tpu.matmul %122, %125, %cst_56 {dimension_numbers = #tpu.dot_dimension_numbers<[2], [2], [1], [1], [0, 0, 0, 1, 1, 1], [0], [0]>} : vector<2x8x8xbf16>, vector<2x8x8xbf16>, vector<2x8x8xf32> -> vector<2x8x8xf32>
    "tpu.trace_stop"() : () -> ()
    %cst_57 = arith.constant 0.353553385 : f32
    %130 = vector.broadcast %cst_57 : f32 to vector<2x8x8xf32>
    %131 = arith.mulf %129, %130 : vector<2x8x8xf32>
    %cst_58 = arith.constant dense<0xFF800000> : vector<2x8xf32>
    %132 = vector.multi_reduction <maximumf>, %131, %cst_58 [2] : vector<2x8x8xf32> to vector<2x8xf32>
    %133 = vector.shape_cast %132 : vector<2x8xf32> to vector<2x8x1xf32>
    %134 = vector.broadcast %133 : vector<2x8x1xf32> to vector<2x8x8xf32>
    %135 = arith.subf %131, %134 : vector<2x8x8xf32>
    %136 = math.exp %135 : vector<2x8x8xf32>
    %cst_59 = arith.constant dense<0.000000e+00> : vector<2x8xf32>
    %137 = vector.multi_reduction <add>, %136, %cst_59 [2] : vector<2x8x8xf32> to vector<2x8xf32>
    %138 = vector.shape_cast %137 : vector<2x8xf32> to vector<2x8x1xf32>
    %139 = tpu.reciprocal %138 {approx = true} : vector<2x8x1xf32> -> vector<2x8x1xf32>
    %140 = vector.broadcast %139 : vector<2x8x1xf32> to vector<2x8x8xf32>
    %141 = arith.mulf %136, %140 : vector<2x8x8xf32>
    %142 = arith.truncf %141 : vector<2x8x8xf32> to vector<2x8x8xbf16>
    "tpu.trace_start"() <{level = 10 : i32, message = "bqk,bkd->bqd"}> : () -> ()
    %cst_60 = arith.constant dense<0.000000e+00> : vector<2x8x8xf32>
    %143 = tpu.matmul %142, %128, %cst_60 {dimension_numbers = #tpu.dot_dimension_numbers<[2], [1], [1], [2], [0, 0, 0, 1, 1, 2], [0], [0]>} : vector<2x8x8xbf16>, vector<2x8x8xbf16>, vector<2x8x8xf32> -> vector<2x8x8xf32>
    "tpu.trace_stop"() : () -> ()
    %144 = vector.shape_cast %143 : vector<2x8x8xf32> to vector<16x8xf32>
    %145 = arith.truncf %144 : vector<16x8xf32> to vector<16x8xbf16>
    %c0_61 = arith.constant 0 : index
    %c16 = arith.constant 16 : index
    %146 = vector.load %arg16[%c0_61, %c16] : memref<16x32xbf16, #tpu.memory_space<vmem>>, vector<16x8xbf16>
    tpu.vector_store %arg16[%c0_61, %c16], %145 {strides = array<i32>} : memref<16x32xbf16, #tpu.memory_space<vmem>>, vector<16x8xbf16>,
    %c0_62 = arith.constant 0 : index
    %c3 = arith.constant 3 : index
    %c0_63 = arith.constant 0 : index
    %c0_64 = arith.constant 0 : index
    %147 = vector.load %arg6[%c0_62, %c3, %c0_63, %c0_64] : memref<1x4x32x24xbf16, #tpu.memory_space<vmem>>, vector<1x1x32x24xbf16>
    %148 = vector.shape_cast %147 : vector<1x1x32x24xbf16> to vector<32x24xbf16>
    %cst_65 = arith.constant dense<0.000000e+00> : vector<16x24xf32>
    %149 = tpu.matmul %44, %148, %cst_65 {dimension_numbers = #tpu.dot_dimension_numbers<[1], [0], [0], [1], [0, 0, 1, 1], [], []>} : vector<16x32xbf16>, vector<32x24xbf16>, vector<16x24xf32> -> vector<16x24xf32>
    %c0_66 = arith.constant 0 : index
    %c3_67 = arith.constant 3 : index
    %c0_68 = arith.constant 0 : index
    %c0_69 = arith.constant 0 : index
    %150 = vector.load %arg7[%c0_66, %c3_67, %c0_68, %c0_69] : memref<1x4x1x24xf32, #tpu.memory_space<vmem>>, vector<1x1x1x24xf32>
    %151 = vector.shape_cast %150 : vector<1x1x1x24xf32> to vector<1x24xf32>
    %152 = vector.broadcast %151 : vector<1x24xf32> to vector<16x24xf32>
    %153 = arith.addf %149, %152 : vector<16x24xf32>
    %154 = vector.extract_strided_slice %153 {offsets = [0, 0], sizes = [16, 8], strides = [1, 1]} : vector<16x24xf32> to vector<16x8xf32>
    %155 = vector.shape_cast %154 : vector<16x8xf32> to vector<2x8x8xf32>
    %156 = arith.truncf %155 : vector<2x8x8xf32> to vector<2x8x8xbf16>
    %157 = vector.extract_strided_slice %153 {offsets = [0, 8], sizes = [16, 8], strides = [1, 1]} : vector<16x24xf32> to vector<16x8xf32>
    %158 = vector.shape_cast %157 : vector<16x8xf32> to vector<2x8x8xf32>
    %159 = arith.truncf %158 : vector<2x8x8xf32> to vector<2x8x8xbf16>
    %160 = vector.extract_strided_slice %153 {offsets = [0, 16], sizes = [16, 8], strides = [1, 1]} : vector<16x24xf32> to vector<16x8xf32>
    %161 = vector.shape_cast %160 : vector<16x8xf32> to vector<2x8x8xf32>
    %162 = arith.truncf %161 : vector<2x8x8xf32> to vector<2x8x8xbf16>
    "tpu.trace_start"() <{level = 10 : i32, message = "bqd,bkd->bqk"}> : () -> ()
    %cst_70 = arith.constant dense<0.000000e+00> : vector<2x8x8xf32>
    %163 = tpu.matmul %156, %159, %cst_70 {dimension_numbers = #tpu.dot_dimension_numbers<[2], [2], [1], [1], [0, 0, 0, 1, 1, 1], [0], [0]>} : vector<2x8x8xbf16>, vector<2x8x8xbf16>, vector<2x8x8xf32> -> vector<2x8x8xf32>
    "tpu.trace_stop"() : () -> ()
    %cst_71 = arith.constant 0.353553385 : f32
    %164 = vector.broadcast %cst_71 : f32 to vector<2x8x8xf32>
    %165 = arith.mulf %163, %164 : vector<2x8x8xf32>
    %cst_72 = arith.constant dense<0xFF800000> : vector<2x8xf32>
    %166 = vector.multi_reduction <maximumf>, %165, %cst_72 [2] : vector<2x8x8xf32> to vector<2x8xf32>
    %167 = vector.shape_cast %166 : vector<2x8xf32> to vector<2x8x1xf32>
    %168 = vector.broadcast %167 : vector<2x8x1xf32> to vector<2x8x8xf32>
    %169 = arith.subf %165, %168 : vector<2x8x8xf32>
    %170 = math.exp %169 : vector<2x8x8xf32>
    %cst_73 = arith.constant dense<0.000000e+00> : vector<2x8xf32>
    %171 = vector.multi_reduction <add>, %170, %cst_73 [2] : vector<2x8x8xf32> to vector<2x8xf32>
    %172 = vector.shape_cast %171 : vector<2x8xf32> to vector<2x8x1xf32>
    %173 = tpu.reciprocal %172 {approx = true} : vector<2x8x1xf32> -> vector<2x8x1xf32>
    %174 = vector.broadcast %173 : vector<2x8x1xf32> to vector<2x8x8xf32>
    %175 = arith.mulf %170, %174 : vector<2x8x8xf32>
    %176 = arith.truncf %175 : vector<2x8x8xf32> to vector<2x8x8xbf16>
    "tpu.trace_start"() <{level = 10 : i32, message = "bqk,bkd->bqd"}> : () -> ()
    %cst_74 = arith.constant dense<0.000000e+00> : vector<2x8x8xf32>
    %177 = tpu.matmul %176, %162, %cst_74 {dimension_numbers = #tpu.dot_dimension_numbers<[2], [1], [1], [2], [0, 0, 0, 1, 1, 2], [0], [0]>} : vector<2x8x8xbf16>, vector<2x8x8xbf16>, vector<2x8x8xf32> -> vector<2x8x8xf32>
    "tpu.trace_stop"() : () -> ()
    %178 = vector.shape_cast %177 : vector<2x8x8xf32> to vector<16x8xf32>
    %179 = arith.truncf %178 : vector<16x8xf32> to vector<16x8xbf16>
    %c0_75 = arith.constant 0 : index
    %c24 = arith.constant 24 : index
    %180 = vector.load %arg16[%c0_75, %c24] : memref<16x32xbf16, #tpu.memory_space<vmem>>, vector<16x8xbf16>
    tpu.vector_store %arg16[%c0_75, %c24], %179 {strides = array<i32>} : memref<16x32xbf16, #tpu.memory_space<vmem>>, vector<16x8xbf16>,
    %c0_76 = arith.constant 0 : index
    %c0_77 = arith.constant 0 : index
    %181 = vector.load %arg16[%c0_76, %c0_77] : memref<16x32xbf16, #tpu.memory_space<vmem>>, vector<16x32xbf16>
    %c0_78 = arith.constant 0 : index
    %c0_79 = arith.constant 0 : index
    %c0_80 = arith.constant 0 : index
    %182 = vector.load %arg8[%c0_78, %c0_79, %c0_80] : memref<1x32x32xbf16, #tpu.memory_space<vmem>>, vector<1x32x32xbf16>
    %183 = vector.shape_cast %182 : vector<1x32x32xbf16> to vector<32x32xbf16>
    %cst_81 = arith.constant dense<0.000000e+00> : vector<16x32xf32>
    %184 = tpu.matmul %181, %183, %cst_81 {dimension_numbers = #tpu.dot_dimension_numbers<[1], [0], [0], [1], [0, 0, 1, 1], [], []>} : vector<16x32xbf16>, vector<32x32xbf16>, vector<16x32xf32> -> vector<16x32xf32>
    %185 = vector.shape_cast %184 : vector<16x32xf32> to vector<2x8x32xf32>
    %c0_82 = arith.constant 0 : index
    %c0_83 = arith.constant 0 : index
    %c0_84 = arith.constant 0 : index
    %186 = vector.load %arg9[%c0_82, %c0_83, %c0_84] : memref<1x1x32xf32, #tpu.memory_space<vmem>>, vector<1x1x32xf32>
    %187 = vector.shape_cast %186 : vector<1x1x32xf32> to vector<1x32xf32>
    %188 = vector.shape_cast %187 : vector<1x32xf32> to vector<1x1x32xf32>
    %189 = vector.broadcast %188 : vector<1x1x32xf32> to vector<2x8x32xf32>
    %190 = arith.addf %185, %189 : vector<2x8x32xf32>
    %191 = vector.broadcast %8 : vector<2x1x32xf32> to vector<2x8x32xf32>
    %192 = arith.mulf %191, %190 : vector<2x8x32xf32>
    %193 = arith.addf %3, %192 : vector<2x8x32xf32>
    %c0_85 = arith.constant 0 : index
    %c0_86 = arith.constant 0 : index
    %c0_87 = arith.constant 0 : index
    %194 = vector.load %arg15[%c0_85, %c0_86, %c0_87] : memref<2x8x32xf32, #tpu.memory_space<vmem>>, vector<2x8x32xf32>
    tpu.vector_store %arg15[%c0_85, %c0_86, %c0_87], %193 {strides = array<i32>} : memref<2x8x32xf32, #tpu.memory_space<vmem>>, vector<2x8x32xf32>,
    %c1_i32 = arith.constant 1 : i32
    %195 = arith.cmpi eq, %arg1, %c1_i32 : i32
    %196 = arith.extui %195 : i1 to i32
    %c0_i32_88 = arith.constant 0 : i32
    %197 = arith.cmpi ne, %196, %c0_i32_88 : i32
    scf.if %197 {
      %c0_89 = arith.constant 0 : index
      %c0_90 = arith.constant 0 : index
      %198 = vector.load %arg10[%c0_89, %c0_90] : memref<1x32xf32, #tpu.memory_space<vmem>>, vector<1x32xf32>
      %c0_91 = arith.constant 0 : index
      %c0_92 = arith.constant 0 : index
      %199 = vector.load %arg11[%c0_91, %c0_92] : memref<1x32xf32, #tpu.memory_space<vmem>>, vector<1x32xf32>
      %cst_93 = arith.constant dense<0.000000e+00> : vector<2x8xf32>
      %200 = vector.multi_reduction <add>, %193, %cst_93 [2] : vector<2x8x32xf32> to vector<2x8xf32>
      %201 = vector.shape_cast %200 : vector<2x8xf32> to vector<2x8x1xf32>
      %cst_94 = arith.constant 3.200000e+01 : f32
      %202 = vector.broadcast %cst_94 : f32 to vector<2x8x1xf32>
      %203 = arith.divf %201, %202 : vector<2x8x1xf32>
      %204 = vector.broadcast %203 : vector<2x8x1xf32> to vector<2x8x32xf32>
      %205 = arith.subf %193, %204 : vector<2x8x32xf32>
      %206 = arith.mulf %205, %205 : vector<2x8x32xf32>
      %cst_95 = arith.constant dense<0.000000e+00> : vector<2x8xf32>
      %207 = vector.multi_reduction <add>, %206, %cst_95 [2] : vector<2x8x32xf32> to vector<2x8xf32>
      %208 = vector.shape_cast %207 : vector<2x8xf32> to vector<2x8x1xf32>
      %cst_96 = arith.constant 3.200000e+01 : f32
      %209 = vector.broadcast %cst_96 : f32 to vector<2x8x1xf32>
      %210 = arith.divf %208, %209 : vector<2x8x1xf32>
      %211 = vector.broadcast %203 : vector<2x8x1xf32> to vector<2x8x32xf32>
      %212 = arith.subf %193, %211 : vector<2x8x32xf32>
      %cst_97 = arith.constant 9.99999974E-6 : f32
      %213 = vector.broadcast %cst_97 : f32 to vector<2x8x1xf32>
      %214 = arith.addf %210, %213 : vector<2x8x1xf32>
      %215 = math.rsqrt %214 : vector<2x8x1xf32>
      %216 = vector.broadcast %215 : vector<2x8x1xf32> to vector<2x8x32xf32>
      %217 = arith.mulf %212, %216 : vector<2x8x32xf32>
      %218 = vector.shape_cast %198 : vector<1x32xf32> to vector<1x1x32xf32>
      %219 = vector.broadcast %218 : vector<1x1x32xf32> to vector<2x8x32xf32>
      %220 = arith.mulf %217, %219 : vector<2x8x32xf32>
      %221 = vector.shape_cast %199 : vector<1x32xf32> to vector<1x1x32xf32>
      %222 = vector.broadcast %221 : vector<1x1x32xf32> to vector<2x8x32xf32>
      %223 = arith.addf %220, %222 : vector<2x8x32xf32>
      %224 = vector.shape_cast %223 : vector<2x8x32xf32> to vector<16x32xf32>
      %225 = arith.truncf %224 : vector<16x32xf32> to vector<16x32xbf16>
      %c0_98 = arith.constant 0 : index
      %c0_99 = arith.constant 0 : index
      %226 = vector.load %arg12[%c0_98, %c0_99] : memref<32x128xbf16, #tpu.memory_space<vmem>>, vector<32x128xbf16>
      %cst_100 = arith.constant dense<0.000000e+00> : vector<16x128xf32>
      %227 = tpu.matmul %225, %226, %cst_100 {dimension_numbers = #tpu.dot_dimension_numbers<[1], [0], [0], [1], [0, 0, 1, 1], [], []>} : vector<16x32xbf16>, vector<32x128xbf16>, vector<16x128xf32> -> vector<16x128xf32>
      %c0_101 = arith.constant 0 : index
      %c0_102 = arith.constant 0 : index
      %228 = vector.load %arg13[%c0_101, %c0_102] : memref<1x128xf32, #tpu.memory_space<vmem>>, vector<1x128xf32>
      %229 = vector.broadcast %228 : vector<1x128xf32> to vector<16x128xf32>
      %230 = arith.addf %227, %229 : vector<16x128xf32>
      %231 = vector.shape_cast %230 : vector<16x128xf32> to vector<2x8x128xf32>
      %232 = arith.truncf %231 : vector<2x8x128xf32> to vector<2x8x128xbf16>
      %c0_103 = arith.constant 0 : index
      %c0_104 = arith.constant 0 : index
      %c0_105 = arith.constant 0 : index
      %233 = vector.load %arg14[%c0_103, %c0_104, %c0_105] : memref<2x8x128xbf16, #tpu.memory_space<vmem>>, vector<2x8x128xbf16>
      tpu.vector_store %arg14[%c0_103, %c0_104, %c0_105], %232 {strides = array<i32>} : memref<2x8x128xbf16, #tpu.memory_space<vmem>>, vector<2x8x128xbf16>,
    } else {
    }
    return
  }
  func.func @transform_0(%arg0: i32, %arg1: i32) -> (i32, i32, i32) {
    %c0_i32 = arith.constant 0 : i32
    %c0_i32_0 = arith.constant 0 : i32
    %c0_i32_1 = arith.constant 0 : i32
    return %arg0, %c0_i32, %c0_i32_0 : i32, i32, i32
  }
  func.func @transform_1(%arg0: i32, %arg1: i32) -> (i32, i32, i32, i32) {
    %c0_i32 = arith.constant 0 : i32
    %c0_i32_0 = arith.constant 0 : i32
    %c0_i32_1 = arith.constant 0 : i32
    return %arg1, %arg0, %c0_i32, %c0_i32_0 : i32, i32, i32, i32
  }
  func.func @transform_2(%arg0: i32, %arg1: i32) -> (i32, i32, i32) {
    %c0_i32 = arith.constant 0 : i32
    %c0_i32_0 = arith.constant 0 : i32
    %c0_i32_1 = arith.constant 0 : i32
    return %arg1, %c0_i32, %c0_i32_0 : i32, i32, i32
  }
  func.func @transform_3(%arg0: i32, %arg1: i32) -> (i32, i32, i32) {
    %c0_i32 = arith.constant 0 : i32
    %c0_i32_0 = arith.constant 0 : i32
    %c0_i32_1 = arith.constant 0 : i32
    return %arg1, %c0_i32, %c0_i32_0 : i32, i32, i32
  }
  func.func @transform_4(%arg0: i32, %arg1: i32) -> (i32, i32, i32, i32) {
    %c0_i32 = arith.constant 0 : i32
    %c0_i32_0 = arith.constant 0 : i32
    %c0_i32_1 = arith.constant 0 : i32
    %c0_i32_2 = arith.constant 0 : i32
    return %arg1, %c0_i32, %c0_i32_0, %c0_i32_1 : i32, i32, i32, i32
  }
  func.func @transform_5(%arg0: i32, %arg1: i32) -> (i32, i32, i32, i32) {
    %c0_i32 = arith.constant 0 : i32
    %c0_i32_0 = arith.constant 0 : i32
    %c0_i32_1 = arith.constant 0 : i32
    %c0_i32_2 = arith.constant 0 : i32
    return %arg1, %c0_i32, %c0_i32_0, %c0_i32_1 : i32, i32, i32, i32
  }
  func.func @transform_6(%arg0: i32, %arg1: i32) -> (i32, i32, i32) {
    %c0_i32 = arith.constant 0 : i32
    %c0_i32_0 = arith.constant 0 : i32
    %c0_i32_1 = arith.constant 0 : i32
    return %arg1, %c0_i32, %c0_i32_0 : i32, i32, i32
  }
  func.func @transform_7(%arg0: i32, %arg1: i32) -> (i32, i32, i32) {
    %c0_i32 = arith.constant 0 : i32
    %c0_i32_0 = arith.constant 0 : i32
    %c0_i32_1 = arith.constant 0 : i32
    return %arg1, %c0_i32, %c0_i32_0 : i32, i32, i32
  }
  func.func @transform_8(%arg0: i32, %arg1: i32) -> (i32, i32) {
    %c0_i32 = arith.constant 0 : i32
    %c0_i32_0 = arith.constant 0 : i32
    %c0_i32_1 = arith.constant 0 : i32
    return %c0_i32, %c0_i32_0 : i32, i32
  }
  func.func @transform_9(%arg0: i32, %arg1: i32) -> (i32, i32) {
    %c0_i32 = arith.constant 0 : i32
    %c0_i32_0 = arith.constant 0 : i32
    %c0_i32_1 = arith.constant 0 : i32
    return %c0_i32, %c0_i32_0 : i32, i32
  }
  func.func @transform_10(%arg0: i32, %arg1: i32) -> (i32, i32) {
    %c0_i32 = arith.constant 0 : i32
    %c0_i32_0 = arith.constant 0 : i32
    %c0_i32_1 = arith.constant 0 : i32
    return %c0_i32, %c0_i32_0 : i32, i32
  }
  func.func @transform_11(%arg0: i32, %arg1: i32) -> (i32, i32) {
    %c0_i32 = arith.constant 0 : i32
    %c0_i32_0 = arith.constant 0 : i32
    %c0_i32_1 = arith.constant 0 : i32
    return %c0_i32, %c0_i32_0 : i32, i32
  }
  func.func @transform_12(%arg0: i32, %arg1: i32) -> (i32, i32, i32) {
    %c0_i32 = arith.constant 0 : i32
    %c0_i32_0 = arith.constant 0 : i32
    %c0_i32_1 = arith.constant 0 : i32
    return %arg0, %c0_i32, %c0_i32_0 : i32, i32, i32
  }
}

</mosaic_0001>

<bundles_post_ra>
// kernel: tpu_custom_call.1
= control target key start
LH: loop header
LB: loop body
LE: loop exit
PB: predicated region body
PF: predicated region fallthrough
CT: control target
= control target key end

     0   :  { %s2257_s0 = inlined_call_operand.vmem [shape: f32[2,8,32], index: 0, kind: input, shape index: {}]   ;;  %s2258_s1 = inlined_call_operand.vmem [shape: f32[2,2,3,32], index: 1, kind: input, shape index: {}]   ;;  %s2259_s2 = inlined_call_operand.vmem [shape: f32[2,1,32], index: 2, kind: input, shape index: {}]   ;;  %s2260_s3 = inlined_call_operand.vmem [shape: f32[2,1,32], index: 3, kind: input, shape index: {}]   ;;  %s2261_s4 = inlined_call_operand.vmem [shape: bf16[2,4,32,24], index: 4, kind: input, shape index: {}]   ;;  %s2262_s5 = inlined_call_operand.vmem [shape: f32[2,4,1,24], index: 5, kind: input, shape index: {}]   ;;  %s2263_s6 = inlined_call_operand.vmem [shape: bf16[2,32,32], index: 6, kind: input, shape index: {}]   ;;  %s2264_s7 = inlined_call_operand.vmem [shape: f32[2,1,32], index: 7, kind: input, shape index: {}]   ;;  %s2265_s8 = inlined_call_operand.vmem [shape: f32[1,32], index: 8, kind: input, shape index: {}]   ;;  %s2266_s9 = inlined_call_operand.vmem [shape: f32[1,32], index: 9, kind: input, shape index: {}]   ;;  %s2267_s10 = inlined_call_operand.vmem [shape: bf16[32,128], index: 10, kind: input, shape index: {}]   ;;  %s2268_s11 = inlined_call_operand.vmem [shape: f32[1,128], index: 11, kind: input, shape index: {}]   ;;  %s2269_s12 = inlined_call_operand.hbm [shape: bf16[2,8,128], index: 12, kind: output, shape index: {}]  }
   0x1   :  { %2272 = sst [smem:[#allocation10_spill]] %s2269_s12 }
   0x2   :  { %17 = vsyncpa [#allocation5], 0  ;;  %s1960_s21 = smov 0   ;;  %s1962_s22 = smov 0  }
   0x3   :  { %s1964_s23 = smov 0  }
   0x4 LB: > { %2273 = sst [smem:[#allocation7_spill]] %s1880_s22  ;;  %s32_s25 = sadd.s32 1, %s1880_s22  ;;  %s1884_s23 = sphi %s1964_s23, %s23_s23   ;;  %s1880_s22 = sphi %s1962_s22, %s2282_s22   ;;  %s1876_s21 = sphi %s1960_s21, %s2281_s21  }
   0x5   : > { %2274 = sst [smem:[#allocation8_spill]] %s1884_s23  ;;  %p33_p0 = scmp.ge.s32.totalorder %s32_s25, 2 }
   0x6   : > { %p1615_p1 = scmp.ge.s32.totalorder %s1884_s23, 1  ;;  %p446_p2 = scmp.lt.s32.totalorder %s1884_s23, 3 }
   0x7   : > { %s2284_s25 = smov (%p33_p0, %s32_s25), 0 }
   0x8   : > { %2275 = sst [smem:[#allocation9_spill]] %s2284_s25  ;;  %p447_p3 = pnand %p1615_p1, %p446_p2 }
   0x9   : > { %p522_p4 = scmp.lt.s32.totalorder (!%p447_p3), %s1876_s21, 1  ;;  %p1623_p5 = scmp.ne.s32.totalorder (!%p447_p3), %s1876_s21, 0 }
   0xa   : > { %450 = sbr.rel (%p447_p3) target bundleno = 2458 (0x99a), region = 68 }
   0xf   : > { %s1983_s26 = scalar_select %p522_p4, %s1876_s21, 1 }
  0x11   : > { %s1718_s27 = sshll.u32 %s1983_s26, 3  ;;  %s536_s18 = scalar_lea.vmem %s2260_s3, %s1983_s26 }
  0x12   : > { %s1993_s15 = scalar_lea.vmem %s2258_s1, %s1718_s27  ;;  %s1719_s19 = sshll.u32 %s1983_s26, 6 }
  0x13   : > { %s1620_s20 = sshll.u32 %s1983_s26, 2  ;;  %s2004_s22 = scalar_lea.vmem %s2261_s4, %s1719_s19 }
  0x14   : > { %s2009_s28 = scalar_lea.vmem %s2262_s5, %s1620_s20  ;;  %s1720_s29 = sshll.u32 %s1983_s26, 4 }
  0x15   : > { %s553_s14 = scalar_lea.vmem %s2264_s7, %s1983_s26  ;;  %s2019_s17 = scalar_lea.vmem %s2263_s6, %s1720_s29 }
  0x16   : > { %559 = sbr.rel (%p1623_p5) target bundleno = 30 (0x1e), region = 72 }
  0x1b   : > { %v560_v0 = vld [vmem:[%s2257_s0] sm:$0xff]  ;;  %vm562_vm0 = vcmask 261120   ;;  %v561_v1 = vld [vmem:[%s2257_s0 + $0x8] sm:$0xff] }
  0x1c   : > { %563 = vst.msk [vmem:[#allocation2] sm:$0xff] %vm562_vm0, %v560_v0 }
  0x1d   : > { %564 = vst.msk [vmem:[#allocation2 + $0x8] sm:$0xff] %vm562_vm0, %v561_v1 }
  0x1e PF: > { %vm571_vm1 = vcmask 261120   ;;  %v1886_v6 = vmov 32.0   ;;  %v1722_v25 = vld [vmem:[%s2004_s22 + $0x8] sm:$0xff]  ;;  %v1721_v27 = vld [vmem:[%s2004_s22] sm:$0xff]  ;;  %v1724_v32 = vld [vmem:[%s2004_s22 + $0x18] sm:$0xff]  ;;  %s2276_s20 = scalar_lea.vmem %s2259_s2, %s1983_s26  ;;  %vm688_vm9 = vcmask 64512  }
  0x1f   : > { %1785 = vrcp.f32 %v1886_v6  ;;  %673 = vmatpush.bf16.msra.mxu0 %v1722_v25  ;;  %v1723_v34 = vld [vmem:[%s2004_s22 + $0x10] sm:$0xff]  ;;  %v1778_v43 = vld [vmem:[%s2276_s20] ss:$0 sm:$0xff]  ;;  %v2059_v48 = vld [vmem:[%s1993_s15 + $0x4] sm:$0x7]  ;;  %vm763_vm10 = vcmask 1043456  }
  0x20   : > { %v2056_v46 = vld [vmem:[%s1993_s15] sm:$0x7]  ;;  %v634_v53 = vadd.f32 1.0, %v2059_v48  ;;  %v640_v63 = vperm.slane %v2059_v48, 0  ;;  %s1887_s15 = smov 120   ;;  %vm803_vm11 = vcmask 60416  }
  0x21   : > { %v1779_v50 = vld [vmem:[%s536_s18] ss:$0 sm:$0xff]  ;;  %v633_v51 = vadd.f32 1.0, %v2056_v46  ;;  %v639_v62 = vperm.slane %v2056_v46, 0  ;;  %s1889_s18 = smov 8   ;;  %vm970_vm12 = vcmask 126016  }
  0x22   : > { %v636_v59 = vperm.slane %v634_v53, 1  ;;  %v1780_v6 = vld [vmem:[%s2009_s28] ss:$0 sm:$0xff]  ;;  %vm1137_vm13 = vcmask 191616   ;;  %s1891_s27 = smov 24   ;;  %vm1304_vm14 = vcmask 257216  }
  0x23   : > { %v2028_v2 = vld [vmem:[#allocation2] sm:$0xff]  ;;  %674 = vmatpush.bf16.msra.mxu0 %v1721_v27  ;;  %v635_v57 = vperm.slane %v633_v51, 1  ;;  %p1704_p6 = scmp.ne.s32.totalorder %s1876_s21, 1 }
  0x24   : > { %v572_v3 = vsel %vm571_vm1, %v2028_v2, 0.0  ;;  %v2032_v4 = vld [vmem:[#allocation2 + $0x8] sm:$0xff] }
  0x25   : > { %573 = vadd.xlane.f32.xlu0 %v572_v3  ;;  %v575_v5 = vsel %vm571_vm1, %v2032_v4, 0.0  ;;  %v1786_v7 = vpop.eup %1785 }
  0x26   : > { %v579_v8 = vmul.f32 32.0, %v1786_v7  ;;  %vm583_vm2 = vweird.f32 %v1786_v7 }
  0x27   : > { %834 = vmatpush.bf16.msrb.mxu0 %v1724_v32 }
  0x28   : > { %v580_v9 = vsub.f32 1.0, %v579_v8 }
  0x2a   : > { %v581_v10 = vmul.f32 %v1786_v7, %v580_v9 }
  0x2b   : > { %835 = vmatpush.bf16.msrb.mxu0 %v1723_v34  ;;  %v1725_v34 = vld [vmem:[%s2004_s22 + $0x20] sm:$0xff] }
  0x2c   : > { %v582_v11 = vadd.f32 %v1786_v7, %v581_v10 }
  0x2d   : > { %576 = vadd.xlane.f32.xlu0 %v575_v5 }
  0x2e   : > { %v2036_v12 = vsel %vm583_vm2, %v1786_v7, %v582_v11 }
  0x98   : > { %v574_v13 = vpop.xlane.xlu0 %573 }
  0x99   : > { %v585_v14 = vmul.f32 %v2036_v12, %v574_v13 }
  0x9b   : > { %v587_v15 = vsub.f32 %v2028_v2, %v585_v14 }
  0x9d   : > { %v589_v16 = vmul.f32 %v587_v15, %v587_v15 }
  0x9f   : > { %v591_v17 = vsel %vm571_vm1, %v589_v16, 0.0 }
  0xa0   : > { %592 = vadd.xlane.f32.xlu1 %v591_v17  ;;  %v577_v18 = vpop.xlane.xlu0 %576  ;;  %v1781_v17 = vld [vmem:[%s2009_s28 + $0x1] ss:$0 sm:$0xff] }
  0xa1   : > { %v586_v19 = vmul.f32 %v2036_v12, %v577_v18 }
  0xa3   : > { %v588_v20 = vsub.f32 %v2032_v4, %v586_v19 }
  0xa5   : > { %v590_v21 = vmul.f32 %v588_v20, %v588_v20 }
  0xa7   : > { %v594_v22 = vsel %vm571_vm1, %v590_v21, 0.0 }
  0xa8   : > { %595 = vadd.xlane.f32.xlu1 %v594_v22 }
 0x113   : > { %v593_v23 = vpop.xlane.xlu1 %592 }
 0x114   : > { %v597_v24 = vmul.f32 %v593_v23, %v2036_v12 }
 0x116   : > { %v599_v26 = vadd.f32 1e-05, %v597_v24 }
 0x118   : > { %1787 = vrsqrt.f32 %v599_v26  ;;  %vm607_vm4 = vweird.f32 %v599_v26 }
 0x11b   : > { %v596_v28 = vpop.xlane.xlu1 %595 }
 0x11c   : > { %v598_v29 = vmul.f32 %v596_v28, %v2036_v12 }
 0x11e   : > { %v1788_v30 = vpop.eup %1787  ;;  %v600_v31 = vadd.f32 1e-05, %v598_v29 }
 0x11f   : > { %v602_v33 = vmul.f32 %v1788_v30, %v599_v26  ;;  %vm608_vm3 = vweird.f32 %v1788_v30 }
 0x120   : > { %1789 = vrsqrt.f32 %v600_v31  ;;  %vm609_vm5 = vmor %vm607_vm4, %vm608_vm3  ;;  %vm617_vm7 = vweird.f32 %v600_v31 }
 0x121   : > { %v603_v35 = vmul.f32 %v1788_v30, %v602_v33 }
 0x123   : > { %v604_v36 = vmul.f32 0.5, %v603_v35 }
 0x125   : > { %v605_v37 = vsub.f32 1.5, %v604_v36 }
 0x126   : > { %v1790_v38 = vpop.eup %1789 }
 0x127   : > { %v606_v39 = vmul.f32 %v1788_v30, %v605_v37  ;;  %v612_v40 = vmul.f32 %v1790_v38, %v600_v31  ;;  %vm618_vm6 = vweird.f32 %v1790_v38  ;;  %v1726_v31 = vld [vmem:[%s2004_s22 + $0x28] sm:$0xff] }
 0x128   : > { %vm619_vm8 = vmor %vm617_vm7, %vm618_vm6 }
 0x129   : > { %v610_v41 = vsel %vm609_vm5, %v1788_v30, %v606_v39  ;;  %v613_v42 = vmul.f32 %v1790_v38, %v612_v40 }
 0x12a   : > { %v621_v44 = vmul.f32 %v610_v41, %v587_v15 }
 0x12b   : > { %v614_v45 = vmul.f32 0.5, %v613_v42 }
 0x12c   : > { %v626_v49 = vmul.f32 %v1778_v43, %v621_v44 }
 0x12d   : > { %v615_v47 = vsub.f32 1.5, %v614_v45  ;;  %v2108_v45 = vld [vmem:[%s2009_s28 + $0x2] ss:$0 sm:$0xff] }
 0x12e   : > { %v631_v56 = vadd.f32 %v1779_v50, %v626_v49 }
 0x12f   : > { %v616_v52 = vmul.f32 %v1790_v38, %v615_v47 }
 0x130   : > { %v637_v61 = vmul.f32 %v635_v57, %v631_v56 }
 0x131   : > { %v620_v54 = vsel %vm619_vm8, %v1790_v38, %v616_v52 }
 0x132   : > { %v622_v55 = vmul.f32 %v620_v54, %v588_v20  ;;  %v641_v1 = vadd.f32 %v639_v62, %v637_v61 }
 0x134   : > { %v627_v58 = vmul.f32 %v1778_v43, %v622_v55 }
 0x136   : > { %v632_v60 = vadd.f32 %v1779_v50, %v627_v58 }
 0x138   : > { %v638_v0 = vmul.f32 %v636_v59, %v632_v60 }
 0x13a   : > { %v642_v3 = vadd.f32 %v640_v63, %v638_v0  ;;  %v1728_v63 = vld [vmem:[%s2004_s22 + $0x38] sm:$0xff] }
 0x13c   : > { %v2070_v5 = vpack.c.bf16 %v642_v3, %v641_v1  ;;  %v1727_v3 = vld [vmem:[%s2004_s22 + $0x30] sm:$0xff]  ;;  %s1888_s22 = smov 112  }
 0x13e   : > { %1632 = vmatmul.msk.bf16.vlgmr.msra.gmra.mxu0 %vm571_vm1, %v2070_v5 }
 0x14e   : > { %1650 = vmatmul.msk.bf16.vlgmr.msrb.gmra.mxu0 %vm571_vm1, %v2070_v5 }
 0x1bb   : > { %v676_v7 = vpop.f32.mrf.mxu0 }
 0x1bc   : > { %v677_v8 = vadd.f32 %v1780_v6, %v676_v7 }
 0x1be   : > { %v681_v9 = vpack.c.bf16 %v677_v8, %v677_v8 }
 0x1c0   : > { %v684_v10 = vunpack.c.l.b16 %v681_v9 }
 0x1c2   : > { %v2077_v11 = vpack.c.b16 %v684_v10, %v684_v10 }
 0x1c3   : > { %v678_v13 = vpop.f32.mrf.mxu0 }
 0x1c4   : > { %v679_v14 = vadd.f32 %v1780_v6, %v678_v13  ;;  %686 = vrot.lane.b32.xlu2 %v2077_v11, %s1887_s15 }
 0x1c6   : > { %v682_v15 = vpack.c.bf16 %v679_v14, %v679_v14 }
 0x1c8   : > { %v709_v16 = vunpack.c.l.b16 %v682_v15 }
 0x1ca   : > { %v2082_v18 = vpack.c.b16 %v709_v16, %v709_v16 }
 0x1cb   : > { %v837_v19 = vpop.f32.mrf.mxu0 }
 0x1cc   : > { %v838_v20 = vadd.f32 %v1781_v17, %v837_v19  ;;  %711 = vrot.lane.b32.xlu0 %v2082_v18, %s1887_s15 }
 0x1ce   : > { %v842_v21 = vpack.c.bf16 %v838_v20, %v838_v20 }
 0x1d0   : > { %v845_v22 = vunpack.c.l.b16 %v842_v21 }
 0x1d2   : > { %v2086_v23 = vpack.c.b16 %v845_v22, %v845_v22 }
 0x1d3   : > { %v839_v24 = vpop.f32.mrf.mxu0 }
 0x1d4   : > { %v840_v25 = vadd.f32 %v1781_v17, %v839_v24  ;;  %847 = vrot.lane.b32.xlu2 %v2086_v23, %s1887_s15 }
 0x1d6   : > { %v843_v26 = vpack.c.bf16 %v840_v25, %v840_v25 }
 0x1d8   : > { %v869_v27 = vunpack.c.l.b16 %v843_v26 }
 0x1da   : > { %v2090_v28 = vpack.c.b16 %v869_v27, %v869_v27 }
 0x1dc   : > { %871 = vrot.lane.b32.xlu1 %v2090_v28, %s1887_s15 }
 0x21e   : > { %v687_v29 = vpop.permute.xlu2 %686 }
 0x21f   : > { %v693_v30 = vsel %vm688_vm9, %v687_v29, 0 }
 0x220   : > { %702 = vmatpush.bf16.xpose.msra.mxu1 %v693_v30 }
 0x227   : > { %1633 = vmatmul.msk.bf16.vlgmr.msra.gmra.mxu1 %vm688_vm9, %v681_v9 }
 0x22e   : > { %v848_v32 = vpop.permute.xlu2 %847 }
 0x22f   : > { %v853_v33 = vsel %vm688_vm9, %v848_v32, 0 }
 0x230   : > { %862 = vmatpush.bf16.xpose.msrb.mxu1 %v853_v33 }
 0x237   : > { %1651 = vmatmul.msk.bf16.vlgmr.msrb.gmra.mxu1 %vm688_vm9, %v842_v21 }
 0x238   : > { %1001 = vmatpush.bf16.msra.mxu1 %v1726_v31 }
 0x23c   : > { %1002 = vmatpush.bf16.msra.mxu1 %v1725_v34  ;;  %v1783_v34 = vld [vmem:[%s2009_s28 + $0x3] ss:$0 sm:$0xff]  ;;  %s1890_s28 = smov 16  }
 0x23e   : > { %v712_v35 = vpop.permute.xlu0 %711 }
 0x23f   : > { %v717_v36 = vsel %vm688_vm9, %v712_v35, 0 }
 0x240   : > { %726 = vmatpush.bf16.xpose.msra.mxu2 %v717_v36 }
 0x247   : > { %1634 = vmatmul.msk.bf16.vlgmr.msra.gmra.mxu2 %vm688_vm9, %v682_v15  ;;  %1668 = vmatmul.msk.bf16.vlgmr.msra.gmra.mxu1 %vm571_vm1, %v2070_v5 }
 0x24e   : > { %v872_v37 = vpop.permute.xlu1 %871 }
 0x24f   : > { %v877_v38 = vsel %vm688_vm9, %v872_v37, 0 }
 0x250   : > { %886 = vmatpush.bf16.xpose.msrb.mxu2 %v877_v38 }
 0x257   : > { %1652 = vmatmul.msk.bf16.vlgmr.msrb.gmra.mxu2 %vm688_vm9, %v843_v26 }
 0x2a4   : > { %v704_v39 = vpop.f32.mrf.mxu1 }
 0x2a5   : > { %v732_v59 = vmul.f32 0.35355338, %v704_v39 }
 0x2a7   : > { %v734_v60 = vsel %vm688_vm9, %v732_v59, -inf }
 0x2ac   : > { %v706_v40 = vpop.f32.mrf.mxu1 }
 0x2b4   : > { %v864_v41 = vpop.f32.mrf.mxu1 }
 0x2b5   : > { %v892_v42 = vmul.f32 0.35355338, %v864_v41 }
 0x2b7   : > { %v894_v43 = vsel %vm688_vm9, %v892_v42, -inf }
 0x2b8   : > { %895 = vmax.xlane.f32.xlu1 %v894_v43 }
 0x2bc   : > { %v866_v44 = vpop.f32.mrf.mxu1 }
 0x2c4   : > { %v1004_v47 = vpop.f32.mrf.mxu1 }
 0x2c5   : > { %v1005_v49 = vadd.f32 %v2108_v45, %v1004_v47 }
 0x2c7   : > { %v1009_v50 = vpack.c.bf16 %v1005_v49, %v1005_v49 }
 0x2c9   : > { %v1012_v51 = vunpack.c.l.b16 %v1009_v50 }
 0x2ca   : > { %v728_v52 = vpop.f32.mrf.mxu2 }
 0x2cb   : > { %v1013_v53 = vpack.c.b16 %v1012_v51, %v1012_v51  ;;  %v733_v54 = vmul.f32 0.35355338, %v728_v52 }
 0x2cc   : > { %v1006_v37 = vpop.f32.mrf.mxu1 }
 0x2cd   : > { %1014 = vrot.lane.b32.xlu2 %v1013_v53, %s1887_s15  ;;  %v737_v55 = vsel %vm688_vm9, %v733_v54, -inf }
 0x2ce   : > { %738 = vmax.xlane.f32.xlu0 %v737_v55 }
 0x2d2   : > { %v730_v56 = vpop.f32.mrf.mxu2 }
 0x2da   : > { %v888_v57 = vpop.f32.mrf.mxu2 }
 0x2db   : > { %v893_v61 = vmul.f32 0.35355338, %v888_v57 }
 0x2dd   : > { %v897_v62 = vsel %vm688_vm9, %v893_v61, -inf }
 0x2e2   : > { %v890_v58 = vpop.f32.mrf.mxu2 }
 0x2f6   : > { %735 = vmax.xlane.f32.xlu2 %v734_v60 }
 0x2fe   : > { %898 = vmax.xlane.f32.xlu2 %v897_v62 }
 0x327   : > { %v1015_v0 = vpop.permute.xlu2 %1014 }
 0x328   : > { %v1020_v1 = vsel %vm688_vm9, %v1015_v0, 0 }
 0x329   : > { %1029 = vmatpush.bf16.xpose.msra.mxu2 %v1020_v1 }
 0x32b   : > { %v896_v6 = vpop.xlane.xlu1 %895 }
 0x32c   : > { %v900_v9 = vsub.f32 %v892_v42, %v896_v6 }
 0x32e   : > { %v902_v13 = vmul.f32 1.442695, %v900_v9 }
 0x330   : > { %1669 = vmatmul.msk.bf16.vlgmr.msra.gmra.mxu2 %vm688_vm9, %v1009_v50 }
 0x331   : > { %1168 = vmatpush.bf16.msrb.mxu2 %v1728_v63 }
 0x335   : > { %1169 = vmatpush.bf16.msrb.mxu2 %v1727_v3 }
 0x340   : > { %1686 = vmatmul.msk.bf16.vlgmr.msrb.gmra.mxu2 %vm571_vm1, %v2070_v5 }
 0x341   : > { %v739_v7 = vpop.xlane.xlu0 %738 }
 0x342   : > { %v741_v8 = vsub.f32 %v733_v54, %v739_v7 }
 0x344   : > { %v744_v10 = vmul.f32 1.442695, %v741_v8 }
 0x346   : > { %1791 = vpow2.f32 %v744_v10 }
 0x347   : > { %1793 = vpow2.f32 %v902_v13 }
 0x34c   : > { %v2121_v14 = vpop.eup %1791 }
 0x34d   : > { %v749_v15 = vsel %vm688_vm9, %v2121_v14, 0.0  ;;  %v2125_v16 = vpop.eup %1793 }
 0x34e   : > { %750 = vadd.xlane.f32.xlu1 %v749_v15  ;;  %v906_v17 = vsel %vm688_vm9, %v2125_v16, 0.0 }
 0x356   : > { %907 = vadd.xlane.f32.xlu1 %v906_v17 }
 0x369   : > { %v736_v5 = vpop.xlane.xlu2 %735 }
 0x36a   : > { %v740_v19 = vsub.f32 %v732_v59, %v736_v5 }
 0x36c   : > { %v742_v20 = vmul.f32 1.442695, %v740_v19 }
 0x36e   : > { %1795 = vpow2.f32 %v742_v20 }
 0x371   : > { %v899_v21 = vpop.xlane.xlu2 %898 }
 0x372   : > { %v901_v22 = vsub.f32 %v893_v61, %v899_v21 }
 0x374   : > { %v1796_v24 = vpop.eup %1795  ;;  %v904_v25 = vmul.f32 1.442695, %v901_v22 }
 0x375   : > { %v746_v26 = vsel %vm688_vm9, %v1796_v24, 0.0 }
 0x376   : > { %1797 = vpow2.f32 %v904_v25  ;;  %747 = vadd.xlane.f32.xlu0 %v746_v26 }
 0x37c   : > { %v1798_v27 = vpop.eup %1797 }
 0x37d   : > { %v909_v29 = vsel %vm688_vm9, %v1798_v27, 0.0 }
 0x37e   : > { %910 = vadd.xlane.f32.xlu1 %v909_v29 }
 0x38a   : > { %780 = vrot.lane.b32.xlu0 %v2082_v18, %s1888_s22  ;;  %v1007_v18 = vadd.f32 %v2108_v45, %v1006_v37 }
 0x38c   : > { %v2141_v38 = vpack.c.bf16 %v1007_v18, %v1007_v18 }
 0x38e   : > { %v1036_v39 = vunpack.c.l.b16 %v2141_v38 }
 0x390   : > { %v2146_v41 = vpack.c.b16 %v1036_v39, %v1036_v39 }
 0x392   : > { %939 = vrot.lane.b32.xlu0 %v2090_v28, %s1888_s22 }
 0x39a   : > { %1085 = vrot.lane.b32.xlu0 %v1013_v53, %s1888_s22 }
 0x3b3   : > { %v1031_v30 = vpop.f32.mrf.mxu2 }
 0x3b4   : > { %v1059_v31 = vmul.f32 0.35355338, %v1031_v30 }
 0x3b6   : > { %v1061_v32 = vsel %vm688_vm9, %v1059_v31, -inf }
 0x3b7   : > { %1062 = vmax.xlane.f32.xlu2 %v1061_v32 }
 0x3bb   : > { %v1033_v33 = vpop.f32.mrf.mxu2 }
 0x3c1   : > { %v751_v43 = vpop.xlane.xlu1 %750 }
 0x3c3   : > { %v1171_v35 = vpop.f32.mrf.mxu2 }
 0x3c4   : > { %v1172_v36 = vadd.f32 %v1783_v34, %v1171_v35 }
 0x3c6   : > { %v1176_v17 = vpack.c.bf16 %v1172_v36, %v1172_v36 }
 0x3c8   : > { %v1179_v19 = vunpack.c.l.b16 %v1176_v17 }
 0x3c9   : > { %v908_v45 = vpop.xlane.xlu1 %907 }
 0x3cb   : > { %v1173_v28 = vpop.f32.mrf.mxu2 }
 0x3cc   : > { %v1174_v40 = vadd.f32 %v1783_v34, %v1173_v28 }
 0x3ce   : > { %v2148_v42 = vpack.c.bf16 %v1174_v40, %v1174_v40 }
 0x3cf   : > { %758 = vrot.lane.b32.xlu2 %v2077_v11, %s1888_s22 }
 0x3d0   : > { %v1203_v11 = vunpack.c.l.b16 %v2148_v42 }
 0x3d2   : > { %v2153_v44 = vpack.c.b16 %v1203_v11, %v1203_v11 }
 0x3d7   : > { %918 = vrot.lane.b32.xlu2 %v2086_v23, %s1888_s22 }
 0x3df   : > { %1038 = vrot.lane.b32.xlu2 %v2146_v41, %s1887_s15 }
 0x3e7   : > { %1205 = vrot.lane.b32.xlu2 %v2153_v44, %s1887_s15 }
 0x3e9   : > { %v748_v23 = vpop.xlane.xlu0 %747 }
 0x3f1   : > { %v911_v47 = vpop.xlane.xlu1 %910 }
 0x3f2   : > { %1799 = vrcp.f32 %v911_v47 }
 0x3f3   : > { %1801 = vrcp.f32 %v748_v23 }
 0x3f8   : > { %v1800_v50 = vpop.eup %1799 }
 0x3f9   : > { %v915_v51 = vmul.f32 %v1800_v50, %v1798_v27  ;;  %v1802_v60 = vpop.eup %1801 }
 0x3fa   : > { %v754_v61 = vmul.f32 %v1802_v60, %v1796_v24  ;;  %v2169_v24 = vpack.c.b16 %v1179_v19, %v1179_v19 }
 0x3fb   : > { %v917_v54 = vpack.c.bf16 %v915_v51, %v915_v51 }
 0x3fc   : > { %v781_v49 = vpop.permute.xlu0 %780  ;;  %v756_v3 = vpack.c.bf16 %v754_v61, %v754_v61 }
 0x3fd   : > { %v786_v0 = vsel %vm763_vm10, %v781_v49, 0 }
 0x404   : > { %v940_v52 = vpop.permute.xlu0 %939 }
 0x405   : > { %v945_v53 = vsel %vm763_vm10, %v940_v52, 0 }
 0x406   : > { %954 = vmatpush.bf16.msra.mxu0 %v945_v53 }
 0x409   : > { %1654 = vmatmul.msk.bf16.vlgmr.msra.gmra.mxu0 %vm688_vm9, %v917_v54 }
 0x40c   : > { %v1086_v55 = vpop.permute.xlu0 %1085 }
 0x40d   : > { %v1091_v56 = vsel %vm763_vm10, %v1086_v55, 0 }
 0x40e   : > { %1100 = vmatpush.bf16.msrb.mxu0 %v1091_v56 }
 0x42a   : > { %v1063_v57 = vpop.xlane.xlu2 %1062 }
 0x42b   : > { %v1067_v58 = vsub.f32 %v1059_v31, %v1063_v57 }
 0x42d   : > { %v1069_v59 = vmul.f32 1.442695, %v1067_v58 }
 0x42f   : > { %1803 = vpow2.f32 %v1069_v59 }
 0x430   : > { %1805 = vrcp.f32 %v751_v43 }
 0x431   : > { %1807 = vrcp.f32 %v908_v45 }
 0x432   : > { %v759_v62 = vpop.permute.xlu2 %758 }
 0x433   : > { %v765_v63 = vsel %vm763_vm10, %v759_v62, 0 }
 0x434   : > { %774 = vmatpush.bf16.msra.mxu3 %v765_v63 }
 0x435   : > { %v1804_v1 = vpop.eup %1803 }
 0x436   : > { %v1073_v6 = vsel %vm688_vm9, %v1804_v1, 0.0  ;;  %v1806_v9 = vpop.eup %1805 }
 0x437   : > { %1074 = vadd.xlane.f32.xlu1 %v1073_v6  ;;  %1635 = vmatmul.msk.bf16.vlgmr.msra.gmra.mxu3 %vm688_vm9, %v756_v3  ;;  %v755_v10 = vmul.f32 %v1806_v9, %v2121_v14  ;;  %v1808_v22 = vpop.eup %1807 }
 0x438   : > { %795 = vmatpush.bf16.msrb.mxu3 %v786_v0  ;;  %v914_v14 = vmul.f32 %v1808_v22, %v2125_v16 }
 0x439   : > { %v757_v15 = vpack.c.bf16 %v755_v10, %v755_v10 }
 0x43a   : > { %v919_v7 = vpop.permute.xlu2 %918  ;;  %v916_v25 = vpack.c.bf16 %v914_v14, %v914_v14 }
 0x43b   : > { %v924_v8 = vsel %vm763_vm10, %v919_v7, 0 }
 0x43c   : > { %933 = vmatpush.bf16.msra.mxu3 %v924_v8 }
 0x442   : > { %v1039_v13 = vpop.permute.xlu2 %1038 }
 0x443   : > { %v1044_v5 = vsel %vm688_vm9, %v1039_v13, 0 }
 0x447   : > { %1636 = vmatmul.msk.bf16.vlgmr.msrb.gmra.mxu3 %vm688_vm9, %v757_v15 }
 0x448   : > { %1053 = vmatpush.bf16.xpose.msrb.mxu3 %v1044_v5 }
 0x44a   : > { %v1206_v20 = vpop.permute.xlu2 %1205 }
 0x44b   : > { %v1211_v21 = vsel %vm688_vm9, %v1206_v20, 0 }
 0x44c   : > { %1220 = vmatpush.bf16.xpose.msra.mxu0 %v1211_v21 }
 0x450   : > { %1181 = vrot.lane.b32.xlu1 %v2169_v24, %s1887_s15 }
 0x457   : > { %1653 = vmatmul.msk.bf16.vlgmr.msra.gmra.mxu3 %vm688_vm9, %v916_v25 }
 0x467   : > { %1670 = vmatmul.msk.bf16.vlgmr.msrb.gmra.mxu3 %vm688_vm9, %v2141_v38 }
 0x486   : > { %v956_v26 = vpop.f32.mrf.mxu0 }
 0x487   : > { %v961_v61 = vpack.c.bf16 %v956_v26, %v956_v26 }
 0x48e   : > { %v958_v27 = vpop.f32.mrf.mxu0 }
 0x4aa   : > { %v1075_v29 = vpop.xlane.xlu1 %1074 }
 0x4ab   : > { %1809 = vrcp.f32 %v1075_v29 }
 0x4b1   : > { %v1810_v30 = vpop.eup %1809 }
 0x4b2   : > { %v1081_v31 = vmul.f32 %v1810_v30, %v1804_v1 }
 0x4b4   : > { %v1083_v32 = vpack.c.bf16 %v1081_v31, %v1081_v31 }
 0x4b6   : > { %1671 = vmatmul.msk.bf16.vlgmr.msrb.gmra.mxu0 %vm688_vm9, %v1083_v32 }
 0x4ba   : > { %v776_v33 = vpop.f32.mrf.mxu3 }
 0x4bb   : > { %v801_v34 = vpack.c.bf16 %v776_v33, %v776_v33 }
 0x4bd   : > { %804 = vst.msk [vmem:[#allocation3] sm:$0xf] %vm803_vm11, %v801_v34 }
 0x4c2   : > { %v1182_v16 = vpop.permute.xlu1 %1181  ;;  %v778_v35 = vpop.f32.mrf.mxu3 }
 0x4c3   : > { %v1187_v36 = vsel %vm688_vm9, %v1182_v16, 0 }
 0x4c4   : > { %1196 = vmatpush.bf16.xpose.msra.mxu3 %v1187_v36 }
 0x4c6   : > { %1688 = vmatmul.msk.bf16.vlgmr.msra.gmra.mxu0 %vm688_vm9, %v2148_v42 }
 0x4ca   : > { %v797_v37 = vpop.f32.mrf.mxu3 }
 0x4cb   : > { %v802_v18 = vpack.c.bf16 %v797_v37, %v797_v37  ;;  %1687 = vmatmul.msk.bf16.vlgmr.msra.gmra.mxu3 %vm688_vm9, %v1176_v17 }
 0x4cd   : > { %805 = vst.msk [vmem:[#allocation3 + $0x4] sm:$0xf] %vm803_vm11, %v802_v18 }
 0x4d2   : > { %v799_v38 = vpop.f32.mrf.mxu3 }
 0x4da   : > { %v935_v28 = vpop.f32.mrf.mxu3 }
 0x4db   : > { %v960_v59 = vpack.c.bf16 %v935_v28, %v935_v28 }
 0x4e2   : > { %v937_v39 = vpop.f32.mrf.mxu3 }
 0x4ea   : > { %v1055_v40 = vpop.f32.mrf.mxu3 }
 0x4eb   : > { %v1060_v11 = vmul.f32 0.35355338, %v1055_v40 }
 0x4ed   : > { %v1064_v43 = vsel %vm688_vm9, %v1060_v11, -inf }
 0x4ee   : > { %1065 = vmax.xlane.f32.xlu0 %v1064_v43 }
 0x4f2   : > { %v1057_v45 = vpop.f32.mrf.mxu3 }
 0x533   : > { %v1102_v23 = vpop.f32.mrf.mxu0 }
 0x534   : > { %v1127_v63 = vpack.c.bf16 %v1102_v23, %v1102_v23  ;;  %v1731_v23 = vld [vmem:[%s2019_s17 + $0x8] sm:$0xff] }
 0x535   : > { %1339 = vmatpush.bf16.msrb.mxu3 %v1731_v23 }
 0x53b   : > { %v1104_v47 = vpop.f32.mrf.mxu0 }
 0x53c   : > { %v1730_v47 = vld [vmem:[%s2019_s17] sm:$0xff] }
 0x53d   : > { %1340 = vmatpush.bf16.msrb.mxu3 %v1730_v47 }
 0x543   : > { %v1222_v49 = vpop.f32.mrf.mxu0 }
 0x544   : > { %v1227_v50 = vmul.f32 0.35355338, %v1222_v49 }
 0x546   : > { %v1231_v42 = vsel %vm688_vm9, %v1227_v50, -inf }
 0x547   : > { %1232 = vmax.xlane.f32.xlu2 %v1231_v42 }
 0x54b   : > { %v1224_v51 = vpop.f32.mrf.mxu0 }
 0x54c   : > { %v1784_v51 = vld [vmem:[%s553_s14] ss:$0 sm:$0xff] }
 0x54e   : > { %v1198_v52 = vpop.f32.mrf.mxu3 }
 0x54f   : > { %v1226_v53 = vmul.f32 0.35355338, %v1198_v52  ;;  %v1353_v52 = vperm.slane %v2056_v46, 2 }
 0x551   : > { %v1228_v54 = vsel %vm688_vm9, %v1226_v53, -inf }
 0x552   : > { %1229 = vmax.xlane.f32.xlu1 %v1228_v54 }
 0x556   : > { %v1200_v55 = vpop.f32.mrf.mxu3 }
 0x55f   : > { %1106 = vrot.lane.b32.xlu2 %v2146_v41, %s1888_s22 }
 0x561   : > { %v1066_v56 = vpop.xlane.xlu0 %1065 }
 0x562   : > { %v1068_v57 = vsub.f32 %v1060_v11, %v1066_v56 }
 0x564   : > { %v1071_v58 = vmul.f32 1.442695, %v1068_v57  ;;  %v1354_v57 = vperm.slane %v2059_v48, 2 }
 0x566   : > { %1811 = vpow2.f32 %v1071_v58 }
 0x567   : > { %964 = vrot.lane.b32.xlu2 %v960_v59, %s1889_s18 }
 0x56b   : > { %1273 = vrot.lane.b32.xlu1 %v2153_v44, %s1888_s22 }
 0x56c   : > { %v1812_v60 = vpop.eup %1811 }
 0x56d   : > { %v1076_v62 = vsel %vm688_vm9, %v1812_v60, 0.0 }
 0x56e   : > { %1077 = vadd.xlane.f32.xlu0 %v1076_v62 }
 0x56f   : > { %966 = vrot.lane.b32.xlu2 %v961_v61, %s1889_s18 }
 0x573   : > { %1131 = vrot.lane.b32.xlu1 %v1127_v63, %s1890_s28 }
 0x5ba   : > { %v1233_v41 = vpop.xlane.xlu2 %1232 }
 0x5bb   : > { %v1235_v7 = vsub.f32 %v1227_v50, %v1233_v41 }
 0x5bd   : > { %v1238_v9 = vmul.f32 1.442695, %v1235_v7 }
 0x5c2   : > { %v1107_v0 = vpop.permute.xlu2 %1106 }
 0x5c3   : > { %v1112_v1 = vsel %vm763_vm10, %v1107_v0, 0 }
 0x5c4   : > { %1121 = vmatpush.bf16.msrb.mxu1 %v1112_v1 }
 0x5c5   : > { %v1230_v3 = vpop.xlane.xlu1 %1229 }
 0x5c6   : > { %v1234_v6 = vsub.f32 %v1226_v53, %v1230_v3 }
 0x5c8   : > { %v1236_v8 = vmul.f32 1.442695, %v1234_v6 }
 0x5ca   : > { %1813 = vpow2.f32 %v1236_v8  ;;  %v965_v44 = vpop.permute.xlu2 %964 }
 0x5cb   : > { %971 = vst.msk [vmem:[#allocation3] sm:$0xf] %vm970_vm12, %v965_v44  ;;  %1815 = vpow2.f32 %v1238_v9 }
 0x5d0   : > { %v1814_v10 = vpop.eup %1813 }
 0x5d1   : > { %v1240_v13 = vsel %vm688_vm9, %v1814_v10, 0.0  ;;  %v1816_v17 = vpop.eup %1815 }
 0x5d2   : > { %1241 = vadd.xlane.f32.xlu0 %v1240_v13  ;;  %v967_v15 = vpop.permute.xlu2 %966  ;;  %v1243_v5 = vsel %vm688_vm9, %v1816_v17, 0.0 }
 0x5d3   : > { %972 = vst.msk [vmem:[#allocation3 + $0x4] sm:$0xf] %vm970_vm12, %v967_v15 }
 0x5da   : > { %1244 = vadd.xlane.f32.xlu0 %v1243_v5 }
 0x5dd   : > { %v1274_v19 = vpop.permute.xlu1 %1273 }
 0x5de   : > { %v1279_v20 = vsel %vm763_vm10, %v1274_v19, 0 }
 0x5df   : > { %1288 = vmatpush.bf16.msra.mxu2 %v1279_v20 }
 0x5e1   : > { %v1078_v21 = vpop.xlane.xlu0 %1077 }
 0x5e2   : > { %1817 = vrcp.f32 %v1078_v21 }
 0x5e5   : > { %v1132_v22 = vpop.permute.xlu1 %1131 }
 0x5e6   : > { %1138 = vst.msk [vmem:[#allocation3] sm:$0xf] %vm1137_vm13, %v1132_v22 }
 0x5e8   : > { %v1818_v14 = vpop.eup %1817 }
 0x5e9   : > { %v1082_v25 = vmul.f32 %v1818_v14, %v1812_v60 }
 0x5eb   : > { %v1084_v26 = vpack.c.bf16 %v1082_v25, %v1082_v25 }
 0x5ed   : > { %1672 = vmatmul.msk.bf16.vlgmr.msrb.gmra.mxu1 %vm688_vm9, %v1084_v26 }
 0x5ee   : > { %1252 = vrot.lane.b32.xlu0 %v2169_v24, %s1888_s22 }
 0x645   : > { %v1242_v27 = vpop.xlane.xlu0 %1241 }
 0x64d   : > { %v1245_v29 = vpop.xlane.xlu0 %1244 }
 0x64e   : > { %1819 = vrcp.f32 %v1245_v29 }
 0x64f   : > { %1821 = vrcp.f32 %v1242_v27 }
 0x654   : > { %v1820_v30 = vpop.eup %1819 }
 0x655   : > { %v1249_v31 = vmul.f32 %v1820_v30, %v1816_v17  ;;  %v1822_v33 = vpop.eup %1821 }
 0x656   : > { %v1248_v34 = vmul.f32 %v1822_v33, %v1814_v10 }
 0x657   : > { %v1251_v32 = vpack.c.bf16 %v1249_v31, %v1249_v31 }
 0x658   : > { %v1250_v36 = vpack.c.bf16 %v1248_v34, %v1248_v34 }
 0x659   : > { %1690 = vmatmul.msk.bf16.vlgmr.msra.gmra.mxu2 %vm688_vm9, %v1251_v32 }
 0x660   : > { %v1253_v16 = vpop.permute.xlu0 %1252 }
 0x661   : > { %v1258_v35 = vsel %vm763_vm10, %v1253_v16, 0 }
 0x662   : > { %1267 = vmatpush.bf16.msra.mxu1 %v1258_v35 }
 0x665   : > { %1689 = vmatmul.msk.bf16.vlgmr.msra.gmra.mxu1 %vm688_vm9, %v1250_v36 }
 0x66a   : > { %v1123_v24 = vpop.f32.mrf.mxu1 }
 0x66b   : > { %v1128_v37 = vpack.c.bf16 %v1123_v24, %v1123_v24 }
 0x66d   : > { %1133 = vrot.lane.b32.xlu0 %v1128_v37, %s1890_s28 }
 0x672   : > { %v1125_v18 = vpop.f32.mrf.mxu1 }
 0x6dc   : > { %v1290_v38 = vpop.f32.mrf.mxu2 }
 0x6dd   : > { %v1295_v28 = vpack.c.bf16 %v1290_v38, %v1290_v38 }
 0x6df   : > { %1300 = vrot.lane.b32.xlu1 %v1295_v28, %s1891_s27  ;;  %v1134_v39 = vpop.permute.xlu0 %1133 }
 0x6e0   : > { %1139 = vst.msk [vmem:[#allocation3 + $0x4] sm:$0xf] %vm1137_vm13, %v1134_v39 }
 0x6e2   : > { %v1269_v40 = vpop.f32.mrf.mxu1 }
 0x6e3   : > { %v1294_v11 = vpack.c.bf16 %v1269_v40, %v1269_v40 }
 0x6e4   : > { %v1292_v43 = vpop.f32.mrf.mxu2 }
 0x6e5   : > { %1298 = vrot.lane.b32.xlu2 %v1294_v11, %s1891_s27 }
 0x6ea   : > { %v1271_v45 = vpop.f32.mrf.mxu1 }
 0x73f   : > { %v1299_v49 = vpop.permute.xlu2 %1298 }
 0x740   : > { %1305 = vst.msk [vmem:[#allocation3] sm:$0xf] %vm1304_vm14, %v1299_v49 }
 0x751   : > { %v1301_v50 = vpop.permute.xlu1 %1300 }
 0x752   : > { %1306 = vst.msk [vmem:[#allocation3 + $0x4] sm:$0xf] %vm1304_vm14, %v1301_v50 }
 0x759   : > { %v1729_v42 = vld [vmem:[#allocation3] sm:$0xff] }
 0x75a   : > { %1703 = vmatmul.msk.bf16.vlgmr.msrb.gmra.mxu3 %vm571_vm1, %v1729_v42 }
 0x7dd   : > { %v1342_v53 = vpop.f32.mrf.mxu3 }
 0x7de   : > { %v1351_v54 = vadd.f32 %v1784_v51, %v1342_v53 }
 0x7e0   : > { %v1355_v55 = vmul.f32 %v1353_v52, %v1351_v54 }
 0x7e2   : > { %v1357_v56 = vadd.f32 %v1355_v55, %v2028_v2 }
 0x7e4   : > { %1359 = vst.msk [vmem:[#allocation2] sm:$0xff] %vm571_vm1, %v1357_v56 }
 0x7e5   : > { %v1344_v58 = vpop.f32.mrf.mxu3 }
 0x7e6   : > { %v1352_v59 = vadd.f32 %v1784_v51, %v1344_v58 }
 0x7e8   : > { %v1356_v60 = vmul.f32 %v1354_v57, %v1352_v59  ;;  %1364 = sbr.rel (%p1704_p6) target bundleno = 2446 (0x98e), region = 76 }
 0x7ea   : > { %v1358_v61 = vadd.f32 %v1356_v60, %v2032_v4 }
 0x7ec   : > { %1360 = vst.msk [vmem:[#allocation2 + $0x8] sm:$0xff] %vm571_vm1, %v1358_v61 }
 0x7ed   : > { %v1367_v46 = vsel %vm571_vm1, %v1357_v56, 0.0  ;;  %v1370_v62 = vsel %vm571_vm1, %v1358_v61, 0.0  ;;  %v1733_v8 = vld [vmem:[%s2267_s10 + $0x8] sm:$0xff]  ;;  %v1732_v9 = vld [vmem:[%s2267_s10] sm:$0xff] }
 0x7ee   : > { %1368 = vadd.xlane.f32.xlu0 %v1367_v46  ;;  %1451 = vmatpush.bf16.msra.mxu0 %v1733_v8  ;;  %v1824_v24 = vld [vmem:[%s2266_s9] ss:$0 sm:$0xff] }
 0x7ef   : > { %v1825_v40 = vld [vmem:[%s2268_s11] ss:$0 sm:$0xff] }
 0x7f2   : > { %1452 = vmatpush.bf16.msra.mxu0 %v1732_v9 }
 0x7f6   : > { %1371 = vadd.xlane.f32.xlu0 %v1370_v62 }
 0x861   : > { %v1369_v2 = vpop.xlane.xlu0 %1368 }
 0x862   : > { %v1373_v63 = vmul.f32 %v1369_v2, %v2036_v12 }
 0x864   : > { %v1375_v48 = vsub.f32 %v1357_v56, %v1373_v63 }
 0x866   : > { %v1377_v41 = vmul.f32 %v1375_v48, %v1375_v48 }
 0x868   : > { %v1379_v0 = vsel %vm571_vm1, %v1377_v41, 0.0 }
 0x869   : > { %1380 = vadd.xlane.f32.xlu1 %v1379_v0  ;;  %v1372_v4 = vpop.xlane.xlu0 %1371 }
 0x86a   : > { %v1374_v1 = vmul.f32 %v1372_v4, %v2036_v12 }
 0x86c   : > { %v1376_v3 = vsub.f32 %v1358_v61, %v1374_v1 }
 0x86e   : > { %v1378_v6 = vmul.f32 %v1376_v3, %v1376_v3 }
 0x870   : > { %v1382_v7 = vsel %vm571_vm1, %v1378_v6, 0.0 }
 0x871   : > { %1383 = vadd.xlane.f32.xlu1 %v1382_v7 }
 0x8dc   : > { %v1381_v44 = vpop.xlane.xlu1 %1380 }
 0x8dd   : > { %v1385_v10 = vmul.f32 %v1381_v44, %v2036_v12 }
 0x8df   : > { %v1387_v13 = vadd.f32 1e-05, %v1385_v10 }
 0x8e1   : > { %1826 = vrsqrt.f32 %v1387_v13  ;;  %vm1395_vm0 = vweird.f32 %v1387_v13 }
 0x8e4   : > { %v1384_v15 = vpop.xlane.xlu1 %1383 }
 0x8e5   : > { %v1386_v17 = vmul.f32 %v1384_v15, %v2036_v12  ;;  %v1823_v12 = vld [vmem:[%s2265_s8] ss:$0 sm:$0xff] }
 0x8e7   : > { %v1827_v5 = vpop.eup %1826  ;;  %v1388_v19 = vadd.f32 1e-05, %v1386_v17 }
 0x8e8   : > { %v1390_v20 = vmul.f32 %v1827_v5, %v1387_v13  ;;  %vm1396_vm15 = vweird.f32 %v1827_v5 }
 0x8e9   : > { %1828 = vrsqrt.f32 %v1388_v19  ;;  %vm1397_vm2 = vmor %vm1395_vm0, %vm1396_vm15  ;;  %vm1405_vm4 = vweird.f32 %v1388_v19 }
 0x8ea   : > { %v1391_v21 = vmul.f32 %v1827_v5, %v1390_v20 }
 0x8ec   : > { %v1392_v22 = vmul.f32 0.5, %v1391_v21 }
 0x8ee   : > { %v1393_v14 = vsub.f32 1.5, %v1392_v22 }
 0x8ef   : > { %v1829_v25 = vpop.eup %1828 }
 0x8f0   : > { %v1394_v26 = vmul.f32 %v1827_v5, %v1393_v14  ;;  %v1400_v27 = vmul.f32 %v1829_v25, %v1388_v19  ;;  %vm1406_vm3 = vweird.f32 %v1829_v25 }
 0x8f1   : > { %vm1407_vm5 = vmor %vm1405_vm4, %vm1406_vm3 }
 0x8f2   : > { %v1401_v29 = vmul.f32 %v1829_v25, %v1400_v27  ;;  %v1398_v31 = vsel %vm1397_vm2, %v1827_v5, %v1394_v26 }
 0x8f3   : > { %v1409_v33 = vmul.f32 %v1398_v31, %v1375_v48 }
 0x8f4   : > { %v1402_v30 = vmul.f32 0.5, %v1401_v29 }
 0x8f5   : > { %v1414_v36 = vmul.f32 %v1823_v12, %v1409_v33 }
 0x8f6   : > { %v1403_v32 = vsub.f32 1.5, %v1402_v30 }
 0x8f7   : > { %v1419_v18 = vadd.f32 %v1824_v24, %v1414_v36 }
 0x8f8   : > { %v1404_v34 = vmul.f32 %v1829_v25, %v1403_v32 }
 0x8fa   : > { %v1408_v16 = vsel %vm1407_vm5, %v1829_v25, %v1404_v34 }
 0x8fb   : > { %v1410_v35 = vmul.f32 %v1408_v16, %v1376_v3 }
 0x8fd   : > { %v1415_v37 = vmul.f32 %v1823_v12, %v1410_v35 }
 0x8ff   : > { %v1420_v38 = vadd.f32 %v1824_v24, %v1415_v37 }
 0x901   : > { %v1421_v28 = vpack.c.bf16 %v1420_v38, %v1419_v18 }
 0x903   : > { %1713 = vmatmul.msk.bf16.vlgmr.msra.gmra.mxu0 %vm571_vm1, %v1421_v28 }
 0x980   : > { %v1454_v39 = vpop.f32.mrf.mxu0 }
 0x981   : > { %v1455_v43 = vadd.f32 %v1825_v40, %v1454_v39 }
 0x988   : > { %v1456_v11 = vpop.f32.mrf.mxu0 }
 0x989   : > { %v1457_v45 = vadd.f32 %v1825_v40, %v1456_v11 }
 0x98b   : > { %v1737_v23 = vpack.c.bf16 %v1457_v45, %v1455_v43 }
 0x98d   : > { %1738 = vst [vmem:[#allocation4] sm:$0xff] %v1737_v23  }
 0x98e PF: > { %s2277_s29 = sld [smem:[#allocation8_spill]]  ;;  %s1892_s27 = smov [#allocation4]  }
 0x98f   : > { %s2279_s18 = sld [smem:[#allocation10_spill]]  ;;  %s1471_s16 = sshll.u32 %s1892_s27, 4  ;;  %s1472_s16 = int_to_ptr.vmem [resolvable:$true] %s1471_s16 }
 0x990   : > { %s1893_s24 = smov 64   ;;  %s1894_s21 = smov 4  }
 0x994   : > { %s2278_s13 = sadd.s32 4294967295, %s2277_s29  }
 0x995   : > { %p1743_p7 = scmp.eq.s32.totalorder %s2278_s13, 1  ;;  %s1473_s28 = sshll.u32 %s2279_s18, 4  ;;  %s1474_s28 = int_to_ptr.hbm [resolvable:$true] %s1473_s28 }
 0x997   : > { %1740 = dma.vmem_to_hbm [thread:$0]  (%p1743_p7), %s1472_s16, 128, %s1474_s28, [#allocation5], %s1893_s24, %s1893_s24, %s1894_s21  }
 0x998   : > { %1871 = dma.done.wait (%p1743_p7), [#allocation5], 128  }
 0x999   : > { %1873 = vsyncadd (%p1743_p7), [#allocation5], 4294967168 }
 0x99a PF: > { %s2280_s26 = sld [smem:[#allocation8_spill]] }
 0x99b   : > { %s2281_s21 = sld [smem:[#allocation7_spill]] }
 0x99c   : > { %s2282_s22 = sld [smem:[#allocation9_spill]] }
 0x9a0   : > { %s23_s23 = sadd.s32 1, %s2280_s26  }
 0x9a1   : > { %p20_p8 = scmp.ge.s32.totalorder %s23_s23, 4  }
 0x9a3   :  { %22 = sbr.rel (!%p20_p8) target bundleno = 4 (0x4), region = 131 }
 0x9a8   :  { %1490 = vsyncpa [#allocation5], 1 }
 0x9a9   :  { %1492 = vsyncpa [#allocation5 + $0x1], 1 }

</bundles_post_ra>
